<compile_context>
chip_gen: v6e
topology: v6e:2x2x1
jax: 0.10.0
libtpu: 0.0.40
codegen_flags: <defaults>
</compile_context>

<pallas_src>
import functools

import numpy as np
import jax
import jax.numpy as jnp
from jax.experimental import pallas as pl
from jax.experimental.pallas import tpu as pltpu

D_PAD = 128  # lane width; every feature dim of this model is <= 128


def _round_up(n, m):
    return ((n + m - 1) // m) * m


def _choose_tiling(batch, tb_max=2048):
    """Pick the batch tile.

    Large tiles amortize the ~0.35 us fixed per-grid-step cost; splitting into
    at least two tiles keeps the 'parallel' batch axis shardable across both
    TensorCores on v7x.  Per-tile VMEM is only ~2.3 KiB/row (double-buffered
    streams + intermediates), so tb <= 2048 is comfortable on every chip.
    """
    b8 = _round_up(max(batch, 1), 8)
    if b8 <= 8:
        tb = b8
    else:
        half = _round_up((b8 + 1) // 2, 8)
        tb = min(_round_up(tb_max, 8), half)
    b_pad = _round_up(b8, tb)
    return tb, b_pad, b_pad // tb


# ----------------------------------------------------------------------------
# Kernel
# ----------------------------------------------------------------------------
def make_vae_struct_kernel(n_enc, n_dec, latent_size, d_in):
    L = latent_size

    def kernel(x_ref, eps_ref, wpack_ref, bpack_ref, y_ref, k_ref):
        # ---------------- Encoder ----------------
        # First layer uses only the d_in real rows of W0 -> K = d_in matmul.
        h = jnp.dot(x_ref[...], wpack_ref[0, :d_in, :],
                    preferred_element_type=jnp.float32) + bpack_ref[0]
        if n_enc > 1:
            h = jnp.tanh(h)
        for i in range(1, n_enc):
            h = jnp.dot(h, wpack_ref[i],
                        preferred_element_type=jnp.float32) + bpack_ref[i]
            if i < n_enc - 1:
                h = jnp.tanh(h)
        k = h                                       # lanes [0, 3L) valid, rest 0
        k_ref[...] = k.astype(k_ref.dtype)          # lane-dense 128-wide store

        # -------- latent_sample (return_mean=0, 'vanilla' weights) ----------
        lane = jax.lax.broadcasted_iota(jnp.int32, k.shape, 1)
        mu_slab = jnp.where(lane < L, k, 0.0)                       # mu at [0, L)
        # Mask k to the logvar lanes BEFORE the exp: exp(0) = 1 elsewhere, and
        # the eps slab is exactly 0 there, so no inf * 0 NaN hazard.
        logvar_slab = jnp.where((lane >= L) & (lane < 2 * L), k, 0.0)
        std_slab = jnp.exp(0.5 * logvar_slab)

        # Place eps (tb, L) into lanes [L, 2L) of a 128-wide slab with a tiny
        # exact selector matmul: P[i, L+i] = 1.
        row = jax.lax.broadcasted_iota(jnp.int32, (L, D_PAD), 0)
        col = jax.lax.broadcasted_iota(jnp.int32, (L, D_PAD), 1)
        sel = (col == row + L).astype(jnp.float32)
        eps_slab = jnp.dot(eps_ref[...], sel,
                           preferred_element_type=jnp.float32)

        # mu at lanes [0,L), eps*std at lanes [L,2L), zero elsewhere.
        t = mu_slab + eps_slab * std_slab

        # ---------------- Decoder ----------------
        # wpack[n_enc] carries the first decoder weight duplicated at rows
        # [0, L) and [L, 2L), so  t @ W == (mu + eps*std) @ W_dec0  exactly.
        h2 = t
        for j in range(n_dec):
            idx = n_enc + j
            h2 = jnp.dot(h2, wpack_ref[idx],
                         preferred_element_type=jnp.float32) + bpack_ref[idx]
            if j < n_dec - 1:
                h2 = jnp.tanh(h2)
        y_ref[...] = jnp.exp(h2).astype(y_ref.dtype)  # lane-dense 128-wide store

    return kernel


# ----------------------------------------------------------------------------
# Host-side packing -- call ONCE at init, reuse across forwards.
# ----------------------------------------------------------------------------
def pack_params(enc_params, dec_params, latent_size, d_pad=D_PAD):
    layers = list(enc_params) + list(dec_params)
    n = len(layers)
    L = latent_size
    wpack = np.zeros((n, d_pad, d_pad), np.float32)
    bpack = np.zeros((n, 1, d_pad), np.float32)
    for i, (w, b) in enumerate(layers):
        w = np.asarray(w, np.float32)
        b = np.asarray(b, np.float32).reshape(-1)
        din, dout = w.shape
        assert din <= d_pad and dout <= d_pad
        wpack[i, :din, :dout] = w
        bpack[i, 0, :dout] = b
    # Duplicate the first decoder layer's weight rows at [L, 2L) so the kernel
    # can feed mu (lanes [0,L)) and eps*std (lanes [L,2L)) through one matmul.
    i0 = len(enc_params)
    w0 = np.asarray(layers[i0][0], np.float32)
    assert w0.shape[0] == L and 3 * L <= d_pad
    wpack[i0, L:2 * L, :w0.shape[1]] = w0
    return jnp.asarray(wpack), jnp.asarray(bpack)


# ----------------------------------------------------------------------------
# Forward: padded-slab variant (hot path) + module-compatible wrapper
# ----------------------------------------------------------------------------
def vae_struct_forward_padded(x, eps, wpack, bpack, *, n_enc, n_dec,
                              latent_size, tb_max=2048):
    B, d_in = x.shape
    L = latent_size
    assert eps.shape == (B, L)
    n_layers = wpack.shape[0]
    assert n_layers == n_enc + n_dec

    tb, B_pad, grid_n = _choose_tiling(B, tb_max)
    x = x.astype(jnp.float32)
    eps = eps.astype(jnp.float32)
    if B_pad != B:  # cheap: pads batch rows only, feature width stays d_in / L
        x = jnp.pad(x, ((0, B_pad - B), (0, 0)))
        eps = jnp.pad(eps, ((0, B_pad - B), (0, 0)))

    kernel = make_vae_struct_kernel(n_enc, n_dec, L, d_in)

    flops = 2 * B_pad * D_PAD * (d_in + (n_layers - 1) * D_PAD + L)
    transc = B_pad * D_PAD * (n_layers + 1)
    bytes_accessed = 4 * (B_pad * (d_in + L + 2 * D_PAD)
                          + int(wpack.size) + int(bpack.size))

    y_pad, k_pad = pl.pallas_call(
        kernel,
        out_shape=(
            jax.ShapeDtypeStruct((B_pad, D_PAD), jnp.float32),   # y (padded)
            jax.ShapeDtypeStruct((B_pad, D_PAD), jnp.float32),   # k (padded)
        ),
        grid=(grid_n,),
        in_specs=[
            pl.BlockSpec((tb, d_in), lambda i: (i, 0)),          # x tile, unpadded lanes
            pl.BlockSpec((tb, L), lambda i: (i, 0)),             # eps tile, unpadded lanes
            pl.BlockSpec(wpack.shape, lambda i: (0, 0, 0)),      # weights, resident
            pl.BlockSpec(bpack.shape, lambda i: (0, 0, 0)),      # biases, resident
        ],
        out_specs=(
            pl.BlockSpec((tb, D_PAD), lambda i: (i, 0)),
            pl.BlockSpec((tb, D_PAD), lambda i: (i, 0)),
        ),
        compiler_params=pltpu.CompilerParams(
            dimension_semantics=("parallel",),        # megacore sharding on v7x
            vmem_limit_bytes=32 * 1024 * 1024),       # safe on v5e/v6e/v7x
        cost_estimate=pl.CostEstimate(flops=int(flops),
                                      transcendentals=int(transc),
                                      bytes_accessed=int(bytes_accessed)),
    )(x, eps, wpack, bpack)
    return y_pad, k_pad


def vae_struct_forward(x, eps, wpack, bpack, *, n_enc, n_dec, latent_size,
                       d_out, tb_max=2048):
    """Module-compatible output tuple (y, k_mu, k_logvar, k_weights, k).

    Performance note: the narrow slices below are separate XLA copies; hot
    paths should consume the padded slabs from vae_struct_forward_padded.
    """
    B = x.shape[0]
    L = latent_size
    y_pad, k_pad = vae_struct_forward_padded(
        x, eps, wpack, bpack, n_enc=n_enc, n_dec=n_dec,
        latent_size=L, tb_max=tb_max)
    y = y_pad[:B, :d_out]
    k = k_pad[:B, :3 * L]
    k_mu = k[:, :L]
    k_logvar = k[:, L:2 * L]
    k_weights = jnp.ones_like(k[:, 2 * L:3 * L])   # cluster_weight_type='vanilla'
    return y, k_mu, k_logvar, k_weights, k


# ----------------------------------------------------------------------------
# Param init (mimics PyTorch nn.Linear default) and pure-JAX reference
# ----------------------------------------------------------------------------
def init_linear(key, fan_in, fan_out):
    kw, kb = jax.random.split(key)
    bound = 1.0 / jnp.sqrt(jnp.float32(fan_in))
    w = jax.random.uniform(kw, (fan_in, fan_out), jnp.float32, -bound, bound)
    b = jax.random.uniform(kb, (fan_out,), jnp.float32, -bound, bound)
    return w, b  # stored as (in, out): y = x @ W + b  ==  PyTorch x @ W.T + b


def reference_forward(x, eps, enc_params, dec_params, latent_size):
    h = x
    for i, (w, b) in enumerate(enc_params):
        h = h @ w + b
        if i < len(enc_params) - 1:
            h = jnp.tanh(h)
    k = h
    L = latent_size
    k_mu, k_logvar = k[:, :L], k[:, L:2 * L]
    k_weights = jnp.ones_like(k[:, 2 * L:3 * L])
    sample = eps * jnp.exp(0.5 * k_logvar) + k_mu
    h2 = sample
    for i, (w, b) in enumerate(dec_params):
        h2 = h2 @ w + b
        if i < len(dec_params) - 1:
            h2 = jnp.tanh(h2)
    y = jnp.exp(h2)
    return y, k_mu, k_logvar, k_weights, k


if __name__ == "__main__":
    # Config consistent with the module:
    #   layer_size_list_struct = [32, 16, 8], num_layers = 2, latent_size = 8
    #   Encoder: Linear(32->16) tanh, Linear(16->24)   (24 = 3 * latent)
    #   Decoder: Linear(8->16)  tanh, Linear(16->32), exp
    layer_sizes = [32, 16, 8]
    num_layers = len(layer_sizes) - 1
    latent_size = layer_sizes[-1]
    B = 512   # -> tb = 256, grid = (2,): both TensorCores busy on v7x

    key = jax.random.PRNGKey(0)
    keys = jax.random.split(key, 2 + 2 * num_layers)

    x = jax.random.normal(keys[0], (B, layer_sizes[0]), jnp.float32)
    eps = jax.random.normal(keys[1], (B, latent_size), jnp.float32)

    enc_params = []
    kidx = 2
    for i in range(num_layers - 1):
        enc_params.append(init_linear(keys[kidx], layer_sizes[i], layer_sizes[i + 1]))
        kidx += 1
    enc_params.append(init_linear(keys[kidx], layer_sizes[-2], 3 * layer_sizes[-1]))
    kidx += 1

    dec_params = []
    for i in range(num_layers, 0, -1):
        dec_params.append(init_linear(keys[kidx], layer_sizes[i], layer_sizes[i - 1]))
        kidx += 1

    # Pack the static weight/bias slabs ONCE (hoisted out of the forward path).
    wpack, bpack = pack_params(enc_params, dec_params, latent_size)
    n_enc, n_dec = len(enc_params), len(dec_params)
    d_out = dec_params[-1][0].shape[1]   # reconstructed feature size

    fwd = jax.jit(functools.partial(
        vae_struct_forward, n_enc=n_enc, n_dec=n_dec,
        latent_size=latent_size, d_out=d_out))

    outs = fwd(x, eps, wpack, bpack)
    outs = jax.block_until_ready(outs)

    refs = reference_forward(x, eps, enc_params, dec_params, latent_size)
    for o, r in zip(outs, refs):
        assert o.shape == r.shape and o.dtype == r.dtype
        assert jnp.allclose(o, r, atol=1e-4, rtol=1e-4), "mismatch vs reference"

    print("KERNEL_OK")
</pallas_src>

<mosaic_0001>
module attributes {stable_mosaic.version = 11 : i64} {
  func.func @kernel(%arg0: i32, %arg1: memref<256x32xf32, #tpu.memory_space<vmem>>, %arg2: memref<256x8xf32, #tpu.memory_space<vmem>>, %arg3: memref<4x128x128xf32, #tpu.memory_space<vmem>>, %arg4: memref<4x1x128xf32, #tpu.memory_space<vmem>>, %arg5: memref<256x128xf32, #tpu.memory_space<vmem>>, %arg6: memref<256x128xf32, #tpu.memory_space<vmem>>) attributes {dimension_semantics = [#tpu.dimension_semantics<parallel>], iteration_bounds = array<i64: 2>, scalar_prefetch = 0 : i64, scratch_operands = 0 : i64, tpu.core_type = #tpu.core_type<tc>, window_params = [{transform_indices = @transform_0, window_bounds = array<i64: 256, 32>}, {transform_indices = @transform_1, window_bounds = array<i64: 256, 8>}, {pipeline_mode = #tpu.pipeline_mode<synchronous>, transform_indices = @transform_2, window_bounds = array<i64: 4, 128, 128>}, {pipeline_mode = #tpu.pipeline_mode<synchronous>, transform_indices = @transform_3, window_bounds = array<i64: 4, 1, 128>}, {transform_indices = @transform_4, window_bounds = array<i64: 256, 128>}, {transform_indices = @transform_5, window_bounds = array<i64: 256, 128>}]} {
    %c0 = arith.constant 0 : index
    %c0_0 = arith.constant 0 : index
    %0 = vector.load %arg1[%c0, %c0_0] : memref<256x32xf32, #tpu.memory_space<vmem>>, vector<256x32xf32>
    %c0_1 = arith.constant 0 : index
    %c0_2 = arith.constant 0 : index
    %c0_3 = arith.constant 0 : index
    %1 = vector.load %arg3[%c0_1, %c0_2, %c0_3] : memref<4x128x128xf32, #tpu.memory_space<vmem>>, vector<1x32x128xf32>
    %2 = vector.shape_cast %1 : vector<1x32x128xf32> to vector<32x128xf32>
    %cst = arith.constant dense<0.000000e+00> : vector<256x128xf32>
    %3 = tpu.matmul %0, %2, %cst {dimension_numbers = #tpu.dot_dimension_numbers<[1], [0], [0], [1], [0, 0, 1, 1], [], []>} : vector<256x32xf32>, vector<32x128xf32>, vector<256x128xf32> -> vector<256x128xf32>
    %c0_4 = arith.constant 0 : index
    %c0_5 = arith.constant 0 : index
    %c0_6 = arith.constant 0 : index
    %4 = vector.load %arg4[%c0_4, %c0_5, %c0_6] : memref<4x1x128xf32, #tpu.memory_space<vmem>>, vector<1x1x128xf32>
    %5 = vector.shape_cast %4 : vector<1x1x128xf32> to vector<1x128xf32>
    %6 = vector.broadcast %5 : vector<1x128xf32> to vector<256x128xf32>
    %7 = arith.addf %3, %6 : vector<256x128xf32>
    %8 = math.tanh %7 : vector<256x128xf32>
    %c1 = arith.constant 1 : index
    %c0_7 = arith.constant 0 : index
    %c0_8 = arith.constant 0 : index
    %9 = vector.load %arg3[%c1, %c0_7, %c0_8] : memref<4x128x128xf32, #tpu.memory_space<vmem>>, vector<1x128x128xf32>
    %10 = vector.shape_cast %9 : vector<1x128x128xf32> to vector<128x128xf32>
    %cst_9 = arith.constant dense<0.000000e+00> : vector<256x128xf32>
    %11 = tpu.matmul %8, %10, %cst_9 {dimension_numbers = #tpu.dot_dimension_numbers<[1], [0], [0], [1], [0, 0, 1, 1], [], []>} : vector<256x128xf32>, vector<128x128xf32>, vector<256x128xf32> -> vector<256x128xf32>
    %c1_10 = arith.constant 1 : index
    %c0_11 = arith.constant 0 : index
    %c0_12 = arith.constant 0 : index
    %12 = vector.load %arg4[%c1_10, %c0_11, %c0_12] : memref<4x1x128xf32, #tpu.memory_space<vmem>>, vector<1x1x128xf32>
    %13 = vector.shape_cast %12 : vector<1x1x128xf32> to vector<1x128xf32>
    %14 = vector.broadcast %13 : vector<1x128xf32> to vector<256x128xf32>
    %15 = arith.addf %11, %14 : vector<256x128xf32>
    %c0_13 = arith.constant 0 : index
    %c0_14 = arith.constant 0 : index
    %16 = vector.load %arg6[%c0_13, %c0_14] : memref<256x128xf32, #tpu.memory_space<vmem>>, vector<256x128xf32>
    tpu.vector_store %arg6[%c0_13, %c0_14], %15 {strides = array<i32>} : memref<256x128xf32, #tpu.memory_space<vmem>>, vector<256x128xf32>,
    %17 = tpu.iota {dimensions = array<i32: 1>} : vector<256x128xi32>
    %c8_i32 = arith.constant 8 : i32
    %18 = vector.broadcast %c8_i32 : i32 to vector<256x128xi32>
    %19 = arith.cmpi slt, %17, %18 : vector<256x128xi32>
    %cst_15 = arith.constant 0.000000e+00 : f32
    %20 = vector.broadcast %cst_15 : f32 to vector<256x128xf32>
    %21 = arith.select %19, %15, %20 : vector<256x128xi1>, vector<256x128xf32>
    %c8_i32_16 = arith.constant 8 : i32
    %22 = vector.broadcast %c8_i32_16 : i32 to vector<256x128xi32>
    %23 = arith.cmpi sge, %17, %22 : vector<256x128xi32>
    %c16_i32 = arith.constant 16 : i32
    %24 = vector.broadcast %c16_i32 : i32 to vector<256x128xi32>
    %25 = arith.cmpi slt, %17, %24 : vector<256x128xi32>
    %26 = arith.andi %23, %25 : vector<256x128xi1>
    %cst_17 = arith.constant 0.000000e+00 : f32
    %27 = vector.broadcast %cst_17 : f32 to vector<256x128xf32>
    %28 = arith.select %26, %15, %27 : vector<256x128xi1>, vector<256x128xf32>
    %cst_18 = arith.constant 5.000000e-01 : f32
    %29 = vector.broadcast %cst_18 : f32 to vector<256x128xf32>
    %30 = arith.mulf %29, %28 : vector<256x128xf32>
    %31 = math.exp %30 : vector<256x128xf32>
    %32 = tpu.iota {dimensions = array<i32: 0>} : vector<8x128xi32>
    %33 = tpu.iota {dimensions = array<i32: 1>} : vector<8x128xi32>
    %c8_i32_19 = arith.constant 8 : i32
    %34 = vector.broadcast %c8_i32_19 : i32 to vector<8x128xi32>
    %35 = arith.addi %32, %34 : vector<8x128xi32>
    %36 = arith.cmpi eq, %33, %35 : vector<8x128xi32>
    %37 = arith.extui %36 : vector<8x128xi1> to vector<8x128xi32>
    %38 = arith.sitofp %37 : vector<8x128xi32> to vector<8x128xf32>
    %c0_20 = arith.constant 0 : index
    %c0_21 = arith.constant 0 : index
    %39 = vector.load %arg2[%c0_20, %c0_21] : memref<256x8xf32, #tpu.memory_space<vmem>>, vector<256x8xf32>
    %cst_22 = arith.constant dense<0.000000e+00> : vector<256x128xf32>
    %40 = tpu.matmul %39, %38, %cst_22 {dimension_numbers = #tpu.dot_dimension_numbers<[1], [0], [0], [1], [0, 0, 1, 1], [], []>} : vector<256x8xf32>, vector<8x128xf32>, vector<256x128xf32> -> vector<256x128xf32>
    %41 = arith.mulf %40, %31 : vector<256x128xf32>
    %42 = arith.addf %21, %41 : vector<256x128xf32>
    %c2 = arith.constant 2 : index
    %c0_23 = arith.constant 0 : index
    %c0_24 = arith.constant 0 : index
    %43 = vector.load %arg3[%c2, %c0_23, %c0_24] : memref<4x128x128xf32, #tpu.memory_space<vmem>>, vector<1x128x128xf32>
    %44 = vector.shape_cast %43 : vector<1x128x128xf32> to vector<128x128xf32>
    %cst_25 = arith.constant dense<0.000000e+00> : vector<256x128xf32>
    %45 = tpu.matmul %42, %44, %cst_25 {dimension_numbers = #tpu.dot_dimension_numbers<[1], [0], [0], [1], [0, 0, 1, 1], [], []>} : vector<256x128xf32>, vector<128x128xf32>, vector<256x128xf32> -> vector<256x128xf32>
    %c2_26 = arith.constant 2 : index
    %c0_27 = arith.constant 0 : index
    %c0_28 = arith.constant 0 : index
    %46 = vector.load %arg4[%c2_26, %c0_27, %c0_28] : memref<4x1x128xf32, #tpu.memory_space<vmem>>, vector<1x1x128xf32>
    %47 = vector.shape_cast %46 : vector<1x1x128xf32> to vector<1x128xf32>
    %48 = vector.broadcast %47 : vector<1x128xf32> to vector<256x128xf32>
    %49 = arith.addf %45, %48 : vector<256x128xf32>
    %50 = math.tanh %49 : vector<256x128xf32>
    %c3 = arith.constant 3 : index
    %c0_29 = arith.constant 0 : index
    %c0_30 = arith.constant 0 : index
    %51 = vector.load %arg3[%c3, %c0_29, %c0_30] : memref<4x128x128xf32, #tpu.memory_space<vmem>>, vector<1x128x128xf32>
    %52 = vector.shape_cast %51 : vector<1x128x128xf32> to vector<128x128xf32>
    %cst_31 = arith.constant dense<0.000000e+00> : vector<256x128xf32>
    %53 = tpu.matmul %50, %52, %cst_31 {dimension_numbers = #tpu.dot_dimension_numbers<[1], [0], [0], [1], [0, 0, 1, 1], [], []>} : vector<256x128xf32>, vector<128x128xf32>, vector<256x128xf32> -> vector<256x128xf32>
    %c3_32 = arith.constant 3 : index
    %c0_33 = arith.constant 0 : index
    %c0_34 = arith.constant 0 : index
    %54 = vector.load %arg4[%c3_32, %c0_33, %c0_34] : memref<4x1x128xf32, #tpu.memory_space<vmem>>, vector<1x1x128xf32>
    %55 = vector.shape_cast %54 : vector<1x1x128xf32> to vector<1x128xf32>
    %56 = vector.broadcast %55 : vector<1x128xf32> to vector<256x128xf32>
    %57 = arith.addf %53, %56 : vector<256x128xf32>
    %58 = math.exp %57 : vector<256x128xf32>
    %c0_35 = arith.constant 0 : index
    %c0_36 = arith.constant 0 : index
    %59 = vector.load %arg5[%c0_35, %c0_36] : memref<256x128xf32, #tpu.memory_space<vmem>>, vector<256x128xf32>
    tpu.vector_store %arg5[%c0_35, %c0_36], %58 {strides = array<i32>} : memref<256x128xf32, #tpu.memory_space<vmem>>, vector<256x128xf32>,
    return
  }
  func.func @transform_0(%arg0: i32) -> (i32, i32) {
    %c0_i32 = arith.constant 0 : i32
    %c0_i32_0 = arith.constant 0 : i32
    return %arg0, %c0_i32 : i32, i32
  }
  func.func @transform_1(%arg0: i32) -> (i32, i32) {
    %c0_i32 = arith.constant 0 : i32
    %c0_i32_0 = arith.constant 0 : i32
    return %arg0, %c0_i32 : i32, i32
  }
  func.func @transform_2(%arg0: i32) -> (i32, i32, i32) {
    %c0_i32 = arith.constant 0 : i32
    %c0_i32_0 = arith.constant 0 : i32
    %c0_i32_1 = arith.constant 0 : i32
    %c0_i32_2 = arith.constant 0 : i32
    return %c0_i32, %c0_i32_0, %c0_i32_1 : i32, i32, i32
  }
  func.func @transform_3(%arg0: i32) -> (i32, i32, i32) {
    %c0_i32 = arith.constant 0 : i32
    %c0_i32_0 = arith.constant 0 : i32
    %c0_i32_1 = arith.constant 0 : i32
    %c0_i32_2 = arith.constant 0 : i32
    return %c0_i32, %c0_i32_0, %c0_i32_1 : i32, i32, i32
  }
  func.func @transform_4(%arg0: i32) -> (i32, i32) {
    %c0_i32 = arith.constant 0 : i32
    %c0_i32_0 = arith.constant 0 : i32
    return %arg0, %c0_i32 : i32, i32
  }
  func.func @transform_5(%arg0: i32) -> (i32, i32) {
    %c0_i32 = arith.constant 0 : i32
    %c0_i32_0 = arith.constant 0 : i32
    return %arg0, %c0_i32 : i32, i32
  }
}

</mosaic_0001>

<bundles_post_ra>
// kernel: vae_struct_forward.1
= control target key start
LH: loop header
LB: loop body
LE: loop exit
PB: predicated region body
PF: predicated region fallthrough
CT: control target
= control target key end

     0   :  { %s3270_s18 = smov 0   ;;  %s4203_s0 = inlined_call_operand.vmem [shape: f32[512,32], index: 0, kind: input, shape index: {}]   ;;  %s4204_s1 = inlined_call_operand.vmem [shape: f32[512,8], index: 1, kind: input, shape index: {}]   ;;  %s4205_s2 = inlined_call_operand.vmem [shape: f32[4,128,128], index: 2, kind: input, shape index: {}]   ;;  %s4206_s3 = inlined_call_operand.vmem [shape: f32[4,1,128], index: 3, kind: input, shape index: {}]   ;;  %s4207_s4 = inlined_call_operand.vmem [shape: f32[512,128], index: 4, kind: output, shape index: {0}]   ;;  %s4208_s5 = inlined_call_operand.vmem [shape: f32[512,128], index: 5, kind: output, shape index: {1}]  }
   0x1 LB: > { %s2263_s19 = sadd.s32 4294967295, %s3237_s18   ;;  %p2267_p0 = scmp.ge.s32.totalorder %s3237_s18, 1  ;;  %s3237_s18 = sphi %s3270_s18, %s16_s18  }
   0x2   : > { %p202_p1 = scmp.lt.s32.totalorder %s3237_s18, 3 }
   0x4   : > { %p203_p2 = pnand %p2267_p0, %p202_p1 }
   0x5   : > { %s2268_s24 = sshll.u32 (!%p203_p2), %s2263_s19, 5 }
   0x6   : > { %206 = sbr.rel (%p203_p2) target bundleno = 939 (0x3ab), region = 36  ;;  %p241_p3 = scmp.lt.s32.totalorder (!%p203_p2), %s2268_s24, 63 }
   0xb   : > { %v299_v0 = vld [vmem:[%s4205_s2 + $0x18] sm:$0xff]  ;;  %v298_v1 = vld [vmem:[%s4205_s2 + $0x10] sm:$0xff]  ;;  %v297_v2 = vld [vmem:[%s4205_s2 + $0x8] sm:$0xff]  ;;  %s4212_s24 = smov (!%p241_p3, %s2268_s24), 63  ;;  %vm307_vm0 = vcmask 261120   ;;  %v943_v48 = vlaneseq  ;;  %v3239_v56 = vmov 1.0  }
   0xc   : > { %2612 = vmatprep.subr.mxu0 %v299_v0  ;;  %2958 = vmatprep.subr.mxu1 %v299_v0  ;;  %v296_v3 = vld [vmem:[%s4205_s2] sm:$0xff]  ;;  %s3290_s29 = sshll.u32 %s4212_s24, 3  ;;  %v2324_v4 = vld [vmem:[%s4205_s2 + $0xf8] sm:$0xff]  ;;  %v2323_v13 = vld [vmem:[%s4205_s2 + $0xf0] sm:$0xff]  ;;  %vm1147_vm2 = vcmask 64512  }
   0xd   : > { %2613 = vmatpush3.msra.mxu0 %v299_v0  ;;  %2962 = vmatpush3.msra.mxu1 %v299_v0  ;;  %s3296_s7 = scalar_lea.vmem %s4203_s0, %s3290_s29  ;;  %v2322_v18 = vld [vmem:[%s4205_s2 + $0xe8] sm:$0xff]  ;;  %v2321_v20 = vld [vmem:[%s4205_s2 + $0xe0] sm:$0xff]  ;;  %v2320_v24 = vld [vmem:[%s4205_s2 + $0xd8] sm:$0xff]  ;;  %v3401_v50 = vand.u32 127, %v943_v48  ;;  %v1110_v51 = vshrl.u32 %v943_v48, 7  ;;  %s3417_s20 = scalar_lea.vmem %s4204_s1, %s3290_s29 }
   0xe   : > { %2614 = vmatprep.subr.mxu0 %v298_v1  ;;  %2959 = vmatprep.subr.mxu1 %v298_v1  ;;  %v264_v5 = vld [vmem:[%s3296_s7] sm:$0xff]  ;;  %v265_v6 = vld [vmem:[%s3296_s7 + $0x8] sm:$0xff]  ;;  %v266_v7 = vld [vmem:[%s3296_s7 + $0x10] sm:$0xff]  ;;  %s3668_s13 = scalar_lea.vmem %s4208_s5, %s3290_s29  ;;  %s4142_s30 = scalar_lea.vmem %s4207_s4, %s3290_s29 }
   0xf   : > { %2615 = vmatpush3.msra.mxu0 %v298_v1  ;;  %2963 = vmatpush3.msra.mxu1 %v298_v1  ;;  %v267_v8 = vld [vmem:[%s3296_s7 + $0x18] sm:$0xff]  ;;  %v268_v9 = vld [vmem:[%s3296_s7 + $0x20] sm:$0xff]  ;;  %v281_v11 = vld [vmem:[%s3296_s7 + $0x88] sm:$0xff]  ;;  %v1111_v53 = vadd.s32 8, %v1110_v51  ;;  %vm978_vm3 = vcmp.ge.s32.totalorder %v3401_v50, 8  ;;  %vm979_vm4 = vcmp.lt.s32.totalorder %v3401_v50, 16 }
  0x10   : > { %2616 = vmatprep.subr.mxu0 %v297_v2  ;;  %2960 = vmatprep.subr.mxu1 %v297_v2  ;;  %v280_v10 = vld [vmem:[%s3296_s7 + $0x80] sm:$0xff]  ;;  %v282_v12 = vld [vmem:[%s3296_s7 + $0x90] sm:$0xff]  ;;  %v269_v14 = vld [vmem:[%s3296_s7 + $0x28] sm:$0xff]  ;;  %vm945_vm6 = vcmp.lt.s32.totalorder %v3401_v50, 8 }
  0x11   : > { %2617 = vmatpush3.msra.mxu0 %v297_v2  ;;  %2964 = vmatpush3.msra.mxu1 %v297_v2  ;;  %v270_v15 = vld [vmem:[%s3296_s7 + $0x30] sm:$0xff]  ;;  %v283_v16 = vld [vmem:[%s3296_s7 + $0x98] sm:$0xff]  ;;  %v284_v17 = vld [vmem:[%s3296_s7 + $0xa0] sm:$0xff]  ;;  %vm1112_vm1 = vcmp.eq.s32.totalorder %v3401_v50, %v1111_v53 }
  0x12   : > { %2618 = vmatprep.subr.mxu0 %v296_v3  ;;  %2961 = vmatprep.subr.mxu1 %v296_v3  ;;  %v271_v19 = vld [vmem:[%s3296_s7 + $0x38] sm:$0xff]  ;;  %v272_v21 = vld [vmem:[%s3296_s7 + $0x40] sm:$0xff]  ;;  %v285_v22 = vld [vmem:[%s3296_s7 + $0xa8] sm:$0xff] }
  0x13   : > { %2619 = vmatpush3.msra.mxu0 %v296_v3  ;;  %2620 = vmatprep.mubr.msk.f32.mxu0 %vm307_vm0, %v264_v5  ;;  %v286_v23 = vld [vmem:[%s3296_s7 + $0xb0] sm:$0xff]  ;;  %v273_v25 = vld [vmem:[%s3296_s7 + $0x48] sm:$0xff]  ;;  %v287_v27 = vld [vmem:[%s3296_s7 + $0xb8] sm:$0xff] }
  0x14   : > { %2621 = vmatmul.mubr.msk.f32.vlgmr.msra.gmra.mxu0 %vm307_vm0, %v265_v6  ;;  %2965 = vmatpush3.msra.mxu1 %v296_v3  ;;  %v274_v26 = vld [vmem:[%s3296_s7 + $0x50] sm:$0xff]  ;;  %v288_v28 = vld [vmem:[%s3296_s7 + $0xc0] sm:$0xff]  ;;  %v275_v30 = vld [vmem:[%s3296_s7 + $0x58] sm:$0xff] }
  0x15   : > { %2623 = vmatprep.mubr.msk.f32.mxu0 %vm307_vm0, %v266_v7  ;;  %2668 = vmatprep.subr.mxu1 %v2324_v4  ;;  %v2319_v29 = vld [vmem:[%s4205_s2 + $0xd0] sm:$0xff]  ;;  %v2318_v31 = vld [vmem:[%s4205_s2 + $0xc8] sm:$0xff]  ;;  %v276_v32 = vld [vmem:[%s3296_s7 + $0x60] sm:$0xff] }
  0x16   : > { %2644 = vmatprep.mubr.msk.f32.mxu1 %vm307_vm0, %v280_v10  ;;  %v289_v33 = vld [vmem:[%s3296_s7 + $0xc8] sm:$0xff]  ;;  %v290_v34 = vld [vmem:[%s3296_s7 + $0xd0] sm:$0xff]  ;;  %v291_v37 = vld [vmem:[%s3296_s7 + $0xd8] sm:$0xff]  ;;  %2748 = vmatprep.subr.msk.mxu0 %vm1112_vm1, %v3239_v56 }
  0x17   : > { %2645 = vmatmul.mubr.msk.f32.vlgmr.msra.gmra.mxu1 %vm307_vm0, %v281_v11  ;;  %v277_v35 = vld [vmem:[%s3296_s7 + $0x68] sm:$0xff]  ;;  %v278_v36 = vld [vmem:[%s3296_s7 + $0x70] sm:$0xff]  ;;  %v292_v38 = vld [vmem:[%s3296_s7 + $0xe0] sm:$0xff]  ;;  %2749 = vmatpush3.msk.msra.mxu0 %vm1112_vm1, %v3239_v56 }
  0x18   : > { %2624 = vmatmul.mubr.msk.f32.gmra.mxu0 %vm307_vm0, %v267_v8  ;;  %2647 = vmatprep.mubr.msk.f32.mxu1 %vm307_vm0, %v282_v12  ;;  %v279_v39 = vld [vmem:[%s3296_s7 + $0x78] sm:$0xff]  ;;  %v293_v40 = vld [vmem:[%s3296_s7 + $0xe8] sm:$0xff]  ;;  %v294_v41 = vld [vmem:[%s3296_s7 + $0xf0] sm:$0xff] }
  0x19   : > { %2626 = vmatprep.mubr.msk.f32.mxu0 %vm307_vm0, %v268_v9  ;;  %2669 = vmatpush3.msra.mxu1 %v2324_v4  ;;  %v295_v42 = vld [vmem:[%s3296_s7 + $0xf8] sm:$0xff]  ;;  %v2317_v43 = vld [vmem:[%s4205_s2 + $0xc0] sm:$0xff]  ;;  %v2315_v45 = vld [vmem:[%s4205_s2 + $0xb0] sm:$0xff] }
  0x1a   : > { %2670 = vmatprep.subr.mxu1 %v2323_v13  ;;  %v2316_v44 = vld [vmem:[%s4205_s2 + $0xb8] sm:$0xff]  ;;  %v2314_v46 = vld [vmem:[%s4205_s2 + $0xa8] sm:$0xff]  ;;  %v2313_v47 = vld [vmem:[%s4205_s2 + $0xa0] sm:$0xff] }
  0x1b   : > { %2671 = vmatpush3.msra.mxu1 %v2323_v13  ;;  %v2312_v49 = vld [vmem:[%s4205_s2 + $0x98] sm:$0xff]  ;;  %v2311_v52 = vld [vmem:[%s4205_s2 + $0x90] sm:$0xff]  ;;  %v2310_v54 = vld [vmem:[%s4205_s2 + $0x88] sm:$0xff] }
  0x1c   : > { %2627 = vmatmul.mubr.msk.f32.gmra.mxu0 %vm307_vm0, %v269_v14  ;;  %2648 = vmatmul.mubr.msk.f32.gmra.mxu1 %vm307_vm0, %v283_v16  ;;  %v2309_v55 = vld [vmem:[%s4205_s2 + $0x80] sm:$0xff]  ;;  %v1116_v58 = vld [vmem:[%s3417_s20 + $0x8] sm:$0xff]  ;;  %v1117_v59 = vld [vmem:[%s3417_s20 + $0x10] sm:$0xff] }
  0x1d   : > { %2629 = vmatprep.mubr.msk.f32.mxu0 %vm307_vm0, %v270_v15  ;;  %2650 = vmatprep.mubr.msk.f32.mxu1 %vm307_vm0, %v284_v17  ;;  %v1115_v57 = vld [vmem:[%s3417_s20] sm:$0xff]  ;;  %v1118_v60 = vld [vmem:[%s3417_s20 + $0x18] sm:$0xff]  ;;  %v1120_v62 = vld [vmem:[%s3417_s20 + $0x28] sm:$0xff] }
  0x1e   : > { %2672 = vmatprep.subr.mxu1 %v2322_v18  ;;  %v1119_v61 = vld [vmem:[%s3417_s20 + $0x20] sm:$0xff]  ;;  %v1121_v63 = vld [vmem:[%s3417_s20 + $0x30] sm:$0xff]  ;;  %v1122_v0 = vld [vmem:[%s3417_s20 + $0x38] sm:$0xff] }
  0x1f   : > { %2673 = vmatpush3.msra.mxu1 %v2322_v18  ;;  %v1123_v1 = vld [vmem:[%s3417_s20 + $0x40] sm:$0xff]  ;;  %v1124_v2 = vld [vmem:[%s3417_s20 + $0x48] sm:$0xff]  ;;  %v1125_v3 = vld [vmem:[%s3417_s20 + $0x50] sm:$0xff] }
  0x20   : > { %2630 = vmatmul.mubr.msk.f32.gmra.mxu0 %vm307_vm0, %v271_v19  ;;  %2674 = vmatprep.subr.mxu1 %v2321_v20  ;;  %v1126_v4 = vld [vmem:[%s3417_s20 + $0x58] sm:$0xff]  ;;  %v1127_v5 = vld [vmem:[%s3417_s20 + $0x60] sm:$0xff]  ;;  %v1128_v6 = vld [vmem:[%s3417_s20 + $0x68] sm:$0xff] }
  0x21   : > { %2632 = vmatprep.mubr.msk.f32.mxu0 %vm307_vm0, %v272_v21  ;;  %2651 = vmatmul.mubr.msk.f32.gmra.mxu1 %vm307_vm0, %v285_v22  ;;  %v1129_v7 = vld [vmem:[%s3417_s20 + $0x70] sm:$0xff]  ;;  %v1130_v8 = vld [vmem:[%s3417_s20 + $0x78] sm:$0xff]  ;;  %v1131_v9 = vld [vmem:[%s3417_s20 + $0x80] sm:$0xff] }
  0x22   : > { %2653 = vmatprep.mubr.msk.f32.mxu1 %vm307_vm0, %v286_v23  ;;  %2675 = vmatpush3.msra.mxu1 %v2321_v20  ;;  %v1132_v10 = vld [vmem:[%s3417_s20 + $0x88] sm:$0xff]  ;;  %v1133_v11 = vld [vmem:[%s3417_s20 + $0x90] sm:$0xff]  ;;  %v1134_v12 = vld [vmem:[%s3417_s20 + $0x98] sm:$0xff] }
  0x23   : > { %2676 = vmatprep.subr.mxu1 %v2320_v24  ;;  %v1135_v13 = vld [vmem:[%s3417_s20 + $0xa0] sm:$0xff]  ;;  %v1136_v14 = vld [vmem:[%s3417_s20 + $0xa8] sm:$0xff]  ;;  %v1137_v15 = vld [vmem:[%s3417_s20 + $0xb0] sm:$0xff] }
  0x24   : > { %2633 = vmatmul.mubr.msk.f32.gmra.mxu0 %vm307_vm0, %v273_v25  ;;  %2677 = vmatpush3.msra.mxu1 %v2320_v24  ;;  %v1138_v16 = vld [vmem:[%s3417_s20 + $0xb8] sm:$0xff]  ;;  %v1139_v17 = vld [vmem:[%s3417_s20 + $0xc0] sm:$0xff]  ;;  %v1140_v19 = vld [vmem:[%s3417_s20 + $0xc8] sm:$0xff] }
  0x25   : > { %2635 = vmatprep.mubr.msk.f32.mxu0 %vm307_vm0, %v274_v26  ;;  %2654 = vmatmul.mubr.msk.f32.gmra.mxu1 %vm307_vm0, %v287_v27  ;;  %v2376_v18 = vld [vmem:[%s4205_s2 + $0x178] sm:$0xff]  ;;  %v1141_v20 = vld [vmem:[%s3417_s20 + $0xd0] sm:$0xff]  ;;  %v1143_v22 = vld [vmem:[%s3417_s20 + $0xe0] sm:$0xff] }
  0x26   : > { %2656 = vmatprep.mubr.msk.f32.mxu1 %vm307_vm0, %v288_v28  ;;  %2678 = vmatprep.subr.mxu1 %v2319_v29  ;;  %v1142_v21 = vld [vmem:[%s3417_s20 + $0xd8] sm:$0xff]  ;;  %v1144_v23 = vld [vmem:[%s3417_s20 + $0xe8] sm:$0xff]  ;;  %v1145_v24 = vld [vmem:[%s3417_s20 + $0xf0] sm:$0xff] }
  0x27   : > { %2679 = vmatpush3.msra.mxu1 %v2319_v29  ;;  %v1146_v25 = vld [vmem:[%s3417_s20 + $0xf8] sm:$0xff]  ;;  %v3489_v26 = vld [vmem:[%s4206_s3] ss:$0 sm:$0xff]  ;;  %vm3660_vm5 = vmand %vm978_vm3, %vm979_vm4 }
  0x28   : > { %2636 = vmatmul.mubr.msk.f32.gmra.mxu0 %vm307_vm0, %v275_v30  ;;  %2680 = vmatprep.subr.mxu1 %v2318_v31  ;;  %v2380_v50 = vld [vmem:[%s4205_s2 + $0x188] sm:$0xff] }
  0x29   : > { %2638 = vmatprep.mubr.msk.f32.mxu0 %vm307_vm0, %v276_v32  ;;  %2657 = vmatmul.mubr.msk.f32.gmra.mxu1 %vm307_vm0, %v289_v33 }
  0x2a   : > { %2659 = vmatprep.mubr.msk.f32.mxu1 %vm307_vm0, %v290_v34  ;;  %2681 = vmatpush3.msra.mxu1 %v2318_v31 }
  0x2b   : > { %2682 = vmatprep.subr.mxu1 %v2317_v43 }
  0x2c   : > { %2639 = vmatmul.mubr.msk.f32.gmra.mxu0 %vm307_vm0, %v277_v35  ;;  %2683 = vmatpush3.msra.mxu1 %v2317_v43 }
  0x2d   : > { %2641 = vmatprep.mubr.msk.f32.mxu0 %vm307_vm0, %v278_v36  ;;  %2660 = vmatmul.mubr.msk.f32.gmra.mxu1 %vm307_vm0, %v291_v37 }
  0x2e   : > { %2662 = vmatprep.mubr.msk.f32.mxu1 %vm307_vm0, %v292_v38  ;;  %2684 = vmatprep.subr.mxu1 %v2316_v44 }
  0x2f   : > { %2685 = vmatpush3.msra.mxu1 %v2316_v44 }
  0x30   : > { %2642 = vmatmul.mubr.msk.f32.gmra.mxu0 %vm307_vm0, %v279_v39  ;;  %2686 = vmatprep.subr.mxu1 %v2315_v45 }
  0x31   : > { %2663 = vmatmul.mubr.msk.f32.gmra.mxu1 %vm307_vm0, %v293_v40  ;;  %2750 = vmatprep.mubr.msk.f32.mxu0 %vm1147_vm2, %v1115_v57  ;;  %v2375_v57 = vld [vmem:[%s4205_s2 + $0x170] sm:$0xff] }
  0x32   : > { %2665 = vmatprep.mubr.msk.f32.mxu1 %vm307_vm0, %v294_v41  ;;  %2687 = vmatpush3.msra.mxu1 %v2315_v45 }
  0x33   : > { %2688 = vmatprep.subr.mxu1 %v2314_v46 }
  0x34   : > { %2689 = vmatpush3.msra.mxu1 %v2314_v46  ;;  %2751 = vmatmul.mubr.msk.f32.vlgmr.msra.gmra.mxu0 %vm1147_vm2, %v1116_v58 }
  0x35   : > { %2666 = vmatmul.mubr.msk.f32.gmra.mxu1 %vm307_vm0, %v295_v42  ;;  %2690 = vmatprep.subr.mxu1 %v2313_v47 }
  0x36   : > { %2691 = vmatpush3.msra.mxu1 %v2313_v47  ;;  %2753 = vmatprep.mubr.msk.f32.mxu0 %vm1147_vm2, %v1117_v59  ;;  %v2374_v59 = vld [vmem:[%s4205_s2 + $0x168] sm:$0xff] }
  0x37   : > { %2692 = vmatprep.subr.mxu1 %v2312_v49 }
  0x38   : > { %2693 = vmatpush3.msra.mxu1 %v2312_v49  ;;  %2754 = vmatmul.mubr.msk.f32.gmra.mxu0 %vm1147_vm2, %v1118_v60 }
  0x39   : > { %2694 = vmatprep.subr.mxu1 %v2311_v52  ;;  %2756 = vmatprep.mubr.msk.f32.mxu0 %vm1147_vm2, %v1119_v61 }
  0x3a   : > { %2695 = vmatpush3.msra.mxu1 %v2311_v52 }
  0x3b   : > { %2696 = vmatprep.subr.mxu1 %v2310_v54 }
  0x3c   : > { %2697 = vmatpush3.msra.mxu1 %v2310_v54  ;;  %2757 = vmatmul.mubr.msk.f32.gmra.mxu0 %vm1147_vm2, %v1120_v62 }
  0x3d   : > { %2698 = vmatprep.subr.mxu1 %v2309_v55  ;;  %2759 = vmatprep.mubr.msk.f32.mxu0 %vm1147_vm2, %v1121_v63 }
  0x3e   : > { %2699 = vmatpush3.msra.mxu1 %v2309_v55 }
  0x3f   : > { %2798 = vmatprep.subr.mxu1 %v2376_v18 }
  0x40   : > { %2760 = vmatmul.mubr.msk.f32.gmra.mxu0 %vm1147_vm2, %v1122_v0 }
  0x41   : > { %2762 = vmatprep.mubr.msk.f32.mxu0 %vm1147_vm2, %v1123_v1 }
  0x44   : > { %2763 = vmatmul.mubr.msk.f32.gmra.mxu0 %vm1147_vm2, %v1124_v2  ;;  %v2373_v2 = vld [vmem:[%s4205_s2 + $0x160] sm:$0xff] }
  0x45   : > { %2765 = vmatprep.mubr.msk.f32.mxu0 %vm1147_vm2, %v1125_v3 }
  0x48   : > { %2766 = vmatmul.mubr.msk.f32.gmra.mxu0 %vm1147_vm2, %v1126_v4  ;;  %v2372_v4 = vld [vmem:[%s4205_s2 + $0x158] sm:$0xff] }
  0x49   : > { %2768 = vmatprep.mubr.msk.f32.mxu0 %vm1147_vm2, %v1127_v5 }
  0x4c   : > { %2769 = vmatmul.mubr.msk.f32.gmra.mxu0 %vm1147_vm2, %v1128_v6 }
  0x4d   : > { %2771 = vmatprep.mubr.msk.f32.mxu0 %vm1147_vm2, %v1129_v7 }
  0x50   : > { %2772 = vmatmul.mubr.msk.f32.gmra.mxu0 %vm1147_vm2, %v1130_v8 }
  0x51   : > { %2774 = vmatprep.mubr.msk.f32.mxu0 %vm1147_vm2, %v1131_v9 }
  0x54   : > { %2775 = vmatmul.mubr.msk.f32.gmra.mxu0 %vm1147_vm2, %v1132_v10 }
  0x55   : > { %2777 = vmatprep.mubr.msk.f32.mxu0 %vm1147_vm2, %v1133_v11  ;;  %v2371_v11 = vld [vmem:[%s4205_s2 + $0x150] sm:$0xff] }
  0x58   : > { %2778 = vmatmul.mubr.msk.f32.gmra.mxu0 %vm1147_vm2, %v1134_v12 }
  0x59   : > { %2780 = vmatprep.mubr.msk.f32.mxu0 %vm1147_vm2, %v1135_v13 }
  0x5c   : > { %2781 = vmatmul.mubr.msk.f32.gmra.mxu0 %vm1147_vm2, %v1136_v14  ;;  %v2370_v14 = vld [vmem:[%s4205_s2 + $0x148] sm:$0xff] }
  0x5d   : > { %2783 = vmatprep.mubr.msk.f32.mxu0 %vm1147_vm2, %v1137_v15 }
  0x60   : > { %2784 = vmatmul.mubr.msk.f32.gmra.mxu0 %vm1147_vm2, %v1138_v16 }
  0x61   : > { %2786 = vmatprep.mubr.msk.f32.mxu0 %vm1147_vm2, %v1139_v17 }
  0x64   : > { %2787 = vmatmul.mubr.msk.f32.gmra.mxu0 %vm1147_vm2, %v1140_v19 }
  0x65   : > { %2789 = vmatprep.mubr.msk.f32.mxu0 %vm1147_vm2, %v1141_v20 }
  0x68   : > { %2790 = vmatmul.mubr.msk.f32.gmra.mxu0 %vm1147_vm2, %v1142_v21  ;;  %v2369_v21 = vld [vmem:[%s4205_s2 + $0x140] sm:$0xff] }
  0x69   : > { %2792 = vmatprep.mubr.msk.f32.mxu0 %vm1147_vm2, %v1143_v22 }
  0x6c   : > { %2793 = vmatmul.mubr.msk.f32.gmra.mxu0 %vm1147_vm2, %v1144_v23  ;;  %v2368_v23 = vld [vmem:[%s4205_s2 + $0x138] sm:$0xff] }
  0x6d   : > { %2795 = vmatprep.mubr.msk.f32.mxu0 %vm1147_vm2, %v1145_v24 }
  0x70   : > { %2796 = vmatmul.mubr.msk.f32.gmra.mxu0 %vm1147_vm2, %v1146_v25 }
  0xd4   : > { %v2622_v27 = vpop.f32.mrf.mxu0 }
  0xd5   : > { %v476_v28 = vadd.f32 %v2622_v27, %v3489_v26 }
  0xd6   : > { %v470_v29 = vpop.f32.mrf.mxu0 }
  0xd7   : > { %v471_v30 = vadd.f32 %v3489_v26, %v470_v29  ;;  %v3493_v32 = vpop.f32.mrf.mxu1 }
  0xd8   : > { %v2625_v31 = vpop.f32.mrf.mxu0  ;;  %v556_v25 = vadd.f32 %v3493_v32, %v3489_v26 }
  0xd9   : > { %2975 = vtanh.f32 %v471_v30  ;;  %v486_v33 = vadd.f32 %v2625_v31, %v3489_v26  ;;  %v3497_v36 = vpop.f32.mrf.mxu1 }
  0xda   : > { %2977 = vtanh.f32 %v476_v28  ;;  %v480_v34 = vpop.f32.mrf.mxu0  ;;  %v551_v13 = vadd.f32 %v3489_v26, %v3497_v36 }
  0xdb   : > { %v481_v35 = vadd.f32 %v3489_v26, %v480_v34 }
  0xdc   : > { %v2628_v37 = vpop.f32.mrf.mxu0  ;;  %v3499_v38 = vpop.f32.mrf.mxu1 }
  0xdd   : > { %2979 = vtanh.f32 %v481_v35  ;;  %v496_v39 = vadd.f32 %v2628_v37, %v3489_v26  ;;  %v566_v31 = vadd.f32 %v3499_v38, %v3489_v26 }
  0xde   : > { %2981 = vtanh.f32 %v486_v33  ;;  %v490_v40 = vpop.f32.mrf.mxu0  ;;  %v3503_v42 = vpop.f32.mrf.mxu1 }
  0xdf   : > { %v491_v41 = vadd.f32 %v3489_v26, %v490_v40  ;;  %v561_v22 = vadd.f32 %v3489_v26, %v3503_v42 }
  0xe0   : > { %v2631_v43 = vpop.f32.mrf.mxu0 }
  0xe1   : > { %2983 = vtanh.f32 %v491_v41  ;;  %v3505_v44 = vpop.f32.mrf.mxu1  ;;  %v506_v45 = vadd.f32 %v2631_v43, %v3489_v26 }
  0xe2   : > { %2985 = vtanh.f32 %v496_v39  ;;  %v500_v46 = vpop.f32.mrf.mxu0  ;;  %v576_v36 = vadd.f32 %v3505_v44, %v3489_v26 }
  0xe3   : > { %v501_v47 = vadd.f32 %v3489_v26, %v500_v46  ;;  %v3509_v48 = vpop.f32.mrf.mxu1 }
  0xe4   : > { %v2634_v49 = vpop.f32.mrf.mxu0  ;;  %v571_v29 = vadd.f32 %v3489_v26, %v3509_v48 }
  0xe5   : > { %2987 = vtanh.f32 %v501_v47  ;;  %v516_v52 = vadd.f32 %v2634_v49, %v3489_v26  ;;  %v3512_v54 = vpop.f32.mrf.mxu1 }
  0xe6   : > { %v2976_v51 = vpop.eup %2975  ;;  %2989 = vtanh.f32 %v506_v45  ;;  %v510_v53 = vpop.f32.mrf.mxu0  ;;  %v586_v42 = vadd.f32 %v3512_v54, %v3489_v26 }
  0xe7   : > { %v2978_v55 = vpop.eup %2977  ;;  %v511_v56 = vadd.f32 %v3489_v26, %v510_v53  ;;  %2700 = vmatprep.mubr.f32.mxu1 %v2976_v51  ;;  %v3522_v63 = vpop.f32.mrf.mxu1 }
  0xe8   : > { %v2637_v58 = vpop.f32.mrf.mxu0  ;;  %2701 = vmatmul.mubr.f32.vlgmr.msra.gmra.mxu1 %v2978_v55  ;;  %v581_v32 = vadd.f32 %v3489_v26, %v3522_v63 }
  0xe9   : > { %2991 = vtanh.f32 %v511_v56  ;;  %2799 = vmatpush3.msra.mxu1 %v2376_v18  ;;  %v526_v61 = vadd.f32 %v2637_v58, %v3489_v26  ;;  %v3532_v8 = vpop.f32.mrf.mxu1 }
  0xea   : > { %v2980_v60 = vpop.eup %2979  ;;  %2993 = vtanh.f32 %v516_v52  ;;  %v520_v62 = vpop.f32.mrf.mxu0  ;;  %2800 = vmatprep.subr.mxu1 %v2375_v57  ;;  %v596_v47 = vadd.f32 %v3532_v8, %v3489_v26  ;;  %v2364_v8 = vld [vmem:[%s4205_s2 + $0x118] sm:$0xff] }
  0xeb   : > { %v2982_v0 = vpop.eup %2981  ;;  %v521_v1 = vadd.f32 %v3489_v26, %v520_v62  ;;  %2703 = vmatprep.mubr.f32.mxu1 %v2980_v60  ;;  %2801 = vmatpush3.msra.mxu1 %v2375_v57  ;;  %v590_v18 = vpop.f32.mrf.mxu1 }
  0xec   : > { %v2640_v3 = vpop.f32.mrf.mxu0  ;;  %2704 = vmatmul.mubr.f32.gmra.mxu1 %v2982_v0  ;;  %2802 = vmatprep.subr.mxu1 %v2374_v59  ;;  %v591_v38 = vadd.f32 %v3489_v26, %v590_v18 }
  0xed   : > { %2995 = vtanh.f32 %v521_v1  ;;  %2803 = vmatpush3.msra.mxu1 %v2374_v59  ;;  %v536_v6 = vadd.f32 %v2640_v3, %v3489_v26  ;;  %v2661_v27 = vpop.f32.mrf.mxu1 }
  0xee   : > { %v2984_v5 = vpop.eup %2983  ;;  %2997 = vtanh.f32 %v526_v61  ;;  %v530_v7 = vpop.f32.mrf.mxu0  ;;  %2804 = vmatprep.subr.mxu1 %v2373_v2  ;;  %v606_v53 = vadd.f32 %v2661_v27, %v3489_v26  ;;  %v2385_v27 = vld [vmem:[%s4205_s2 + $0x1b0] sm:$0xff] }
  0xef   : > { %v2986_v9 = vpop.eup %2985  ;;  %v531_v10 = vadd.f32 %v3489_v26, %v530_v7  ;;  %2706 = vmatprep.mubr.f32.mxu1 %v2984_v5  ;;  %2805 = vmatpush3.msra.mxu1 %v2373_v2  ;;  %v600_v33 = vpop.f32.mrf.mxu1  ;;  %v2365_v7 = vld [vmem:[%s4205_s2 + $0x120] sm:$0xff] }
  0xf0   : > { %v2643_v12 = vpop.f32.mrf.mxu0  ;;  %2707 = vmatmul.mubr.f32.gmra.mxu1 %v2986_v9  ;;  %2806 = vmatprep.subr.mxu1 %v2372_v4  ;;  %v601_v44 = vadd.f32 %v3489_v26, %v600_v33  ;;  %v2363_v9 = vld [vmem:[%s4205_s2 + $0x110] sm:$0xff] }
  0xf1   : > { %2999 = vtanh.f32 %v531_v10  ;;  %2807 = vmatpush3.msra.mxu1 %v2372_v4  ;;  %v546_v16 = vadd.f32 %v2643_v12, %v3489_v26  ;;  %v2664_v37 = vpop.f32.mrf.mxu1  ;;  %v2362_v10 = vld [vmem:[%s4205_s2 + $0x108] sm:$0xff] }
  0xf2   : > { %v2988_v15 = vpop.eup %2987  ;;  %3001 = vtanh.f32 %v536_v6  ;;  %v540_v17 = vpop.f32.mrf.mxu0  ;;  %2808 = vmatprep.subr.mxu1 %v2371_v11  ;;  %v616_v58 = vadd.f32 %v2664_v37, %v3489_v26  ;;  %v2366_v6 = vld [vmem:[%s4205_s2 + $0x128] sm:$0xff] }
  0xf3   : > { %v2990_v19 = vpop.eup %2989  ;;  %v541_v20 = vadd.f32 %v3489_v26, %v540_v17  ;;  %2709 = vmatprep.mubr.f32.mxu1 %v2988_v15  ;;  %2809 = vmatpush3.msra.mxu1 %v2371_v11  ;;  %3003 = vtanh.f32 %v551_v13  ;;  %v610_v43 = vpop.f32.mrf.mxu1  ;;  %v2361_v11 = vld [vmem:[%s4205_s2 + $0x100] sm:$0xff]  ;;  %v2394_v13 = vld [vmem:[%s4205_s2 + $0x1f8] sm:$0xff] }
  0xf4   : > { %2710 = vmatmul.mubr.f32.gmra.mxu1 %v2990_v19  ;;  %2810 = vmatprep.subr.mxu1 %v2370_v14  ;;  %v611_v51 = vadd.f32 %v3489_v26, %v610_v43  ;;  %v3595_v12 = vpop.f32.mrf.mxu0  ;;  %v2391_v17 = vld [vmem:[%s4205_s2 + $0x1e0] sm:$0xff]  ;;  %v2390_v19 = vld [vmem:[%s4205_s2 + $0x1d8] sm:$0xff] }
  0xf5   : > { %3005 = vtanh.f32 %v541_v20  ;;  %2811 = vmatpush3.msra.mxu1 %v2370_v14  ;;  %v2667_v48 = vpop.f32.mrf.mxu1  ;;  %v2393_v14 = vld [vmem:[%s4205_s2 + $0x1f0] sm:$0xff]  ;;  %2878 = vmatprep.subr.mxu0 %v2394_v13 }
  0xf6   : > { %v2992_v24 = vpop.eup %2991  ;;  %3007 = vtanh.f32 %v546_v16  ;;  %2812 = vmatprep.subr.mxu1 %v2369_v21  ;;  %v626_v61 = vadd.f32 %v2667_v48, %v3489_v26  ;;  %v3603_v15 = vpop.f32.mrf.mxu0  ;;  %2879 = vmatpush3.msra.mxu0 %v2394_v13  ;;  %v2392_v16 = vld [vmem:[%s4205_s2 + $0x1e8] sm:$0xff]  ;;  %v2389_v20 = vld [vmem:[%s4205_s2 + $0x1d0] sm:$0xff] }
  0xf7   : > { %v2994_v28 = vpop.eup %2993  ;;  %2712 = vmatprep.mubr.f32.mxu1 %v2992_v24  ;;  %2813 = vmatpush3.msra.mxu1 %v2369_v21  ;;  %3009 = vtanh.f32 %v561_v22  ;;  %v620_v54 = vpop.f32.mrf.mxu1  ;;  %v2388_v22 = vld [vmem:[%s4205_s2 + $0x1c8] sm:$0xff] }
  0xf8   : > { %2713 = vmatmul.mubr.f32.gmra.mxu1 %v2994_v28  ;;  %2814 = vmatprep.subr.mxu1 %v2368_v23  ;;  %3011 = vtanh.f32 %v556_v25  ;;  %v621_v56 = vadd.f32 %v3489_v26, %v620_v54  ;;  %v2367_v26 = vld [vmem:[%s4205_s2 + $0x130] sm:$0xff]  ;;  %v3611_v18 = vpop.f32.mrf.mxu0  ;;  %v2386_v25 = vld [vmem:[%s4205_s2 + $0x1b8] sm:$0xff] }
  0xf9   : > { %2815 = vmatpush3.msra.mxu1 %v2368_v23  ;;  %3013 = vtanh.f32 %v571_v29  ;;  %2880 = vmatprep.subr.mxu0 %v2393_v14  ;;  %v2387_v23 = vld [vmem:[%s4205_s2 + $0x1c0] sm:$0xff]  ;;  %v2384_v29 = vld [vmem:[%s4205_s2 + $0x1a8] sm:$0xff] }
  0xfa   : > { %v2996_v30 = vpop.eup %2995  ;;  %3015 = vtanh.f32 %v566_v31  ;;  %2816 = vmatprep.subr.mxu1 %v2367_v26  ;;  %2881 = vmatpush3.msra.mxu0 %v2393_v14  ;;  %v3619_v21 = vpop.f32.mrf.mxu0 }
  0xfb   : > { %v2998_v34 = vpop.eup %2997  ;;  %2715 = vmatprep.mubr.f32.mxu1 %v2996_v30  ;;  %3017 = vtanh.f32 %v581_v32  ;;  %2817 = vmatpush3.msra.mxu1 %v2367_v26  ;;  %v2383_v30 = vld [vmem:[%s4205_s2 + $0x1a0] sm:$0xff] }
  0xfc   : > { %2716 = vmatmul.mubr.f32.gmra.mxu1 %v2998_v34  ;;  %3019 = vtanh.f32 %v576_v36  ;;  %2818 = vmatprep.subr.mxu1 %v2366_v6  ;;  %v3627_v24 = vpop.f32.mrf.mxu0 }
  0xfd   : > { %3021 = vtanh.f32 %v591_v38  ;;  %2819 = vmatpush3.msra.mxu1 %v2366_v6  ;;  %2882 = vmatprep.subr.mxu0 %v2392_v16 }
  0xfe   : > { %v3000_v35 = vpop.eup %2999  ;;  %3023 = vtanh.f32 %v586_v42  ;;  %2820 = vmatprep.subr.mxu1 %v2365_v7  ;;  %2883 = vmatpush3.msra.mxu0 %v2392_v16  ;;  %v3635_v28 = vpop.f32.mrf.mxu0 }
  0xff   : > { %v3002_v39 = vpop.eup %3001  ;;  %2718 = vmatprep.mubr.f32.mxu1 %v3000_v35  ;;  %3025 = vtanh.f32 %v601_v44  ;;  %2821 = vmatpush3.msra.mxu1 %v2365_v7  ;;  %v3656_v35 = vld [vmem:[%s4206_s3 + $0x1] ss:$0 sm:$0xff] }
 0x100   : > { %2719 = vmatmul.mubr.f32.gmra.mxu1 %v3002_v39  ;;  %v3004_v40 = vpop.eup %3003  ;;  %3027 = vtanh.f32 %v596_v47  ;;  %2822 = vmatprep.subr.mxu1 %v2364_v8  ;;  %v3643_v31 = vpop.f32.mrf.mxu0 }
 0x101   : > { %3029 = vtanh.f32 %v611_v51  ;;  %2823 = vmatpush3.msra.mxu1 %v2364_v8  ;;  %2884 = vmatprep.subr.mxu0 %v2391_v17 }
 0x102   : > { %v3006_v41 = vpop.eup %3005  ;;  %3031 = vtanh.f32 %v606_v53  ;;  %2824 = vmatprep.subr.mxu1 %v2363_v9  ;;  %2885 = vmatpush3.msra.mxu0 %v2391_v17  ;;  %v3645_v33 = vpop.f32.mrf.mxu0 }
 0x103   : > { %v3008_v45 = vpop.eup %3007  ;;  %2721 = vmatprep.mubr.f32.mxu1 %v3006_v41  ;;  %3033 = vtanh.f32 %v621_v56  ;;  %2825 = vmatpush3.msra.mxu1 %v2363_v9 }
 0x104   : > { %2722 = vmatmul.mubr.f32.gmra.mxu1 %v3008_v45  ;;  %v3010_v46 = vpop.eup %3009  ;;  %3035 = vtanh.f32 %v616_v58  ;;  %2826 = vmatprep.subr.mxu1 %v2362_v10  ;;  %v3647_v34 = vpop.f32.mrf.mxu0 }
 0x105   : > { %2724 = vmatprep.mubr.f32.mxu1 %v3004_v40  ;;  %v3012_v49 = vpop.eup %3011  ;;  %3037 = vtanh.f32 %v626_v61  ;;  %2827 = vmatpush3.msra.mxu1 %v2362_v10 }
 0x106   : > { %v3014_v52 = vpop.eup %3013  ;;  %2828 = vmatprep.subr.mxu1 %v2361_v11  ;;  %2886 = vmatprep.subr.mxu0 %v2390_v19  ;;  %v3649_v32 = vpop.f32.mrf.mxu0 }
 0x107   : > { %v3016_v55 = vpop.eup %3015  ;;  %2829 = vmatpush3.msra.mxu1 %v2361_v11  ;;  %2887 = vmatpush3.msra.mxu0 %v2390_v19 }
 0x108   : > { %2725 = vmatmul.mubr.f32.gmra.mxu1 %v3012_v49  ;;  %v3018_v57 = vpop.eup %3017  ;;  %2888 = vmatprep.subr.mxu0 %v2389_v20  ;;  %v3658_v36 = vpop.f32.mrf.mxu0 }
 0x109   : > { %2727 = vmatprep.mubr.f32.mxu1 %v3010_v46  ;;  %v3020_v59 = vpop.eup %3019  ;;  %2889 = vmatpush3.msra.mxu0 %v2389_v20 }
 0x10a   : > { %v3022_v60 = vpop.eup %3021  ;;  %2890 = vmatprep.subr.mxu0 %v2388_v22  ;;  %v3681_v43 = vpop.f32.mrf.mxu0 }
 0x10b   : > { %v3024_v62 = vpop.eup %3023  ;;  %2891 = vmatpush3.msra.mxu0 %v2388_v22 }
 0x10c   : > { %2728 = vmatmul.mubr.f32.gmra.mxu1 %v3016_v55  ;;  %v3026_v63 = vpop.eup %3025  ;;  %2892 = vmatprep.subr.mxu0 %v2387_v23  ;;  %v3699_v54 = vpop.f32.mrf.mxu0 }
 0x10d   : > { %2730 = vmatprep.mubr.f32.mxu1 %v3014_v52  ;;  %v3028_v0 = vpop.eup %3027  ;;  %2893 = vmatpush3.msra.mxu0 %v2387_v23 }
 0x10e   : > { %v3030_v1 = vpop.eup %3029  ;;  %2894 = vmatprep.subr.mxu0 %v2386_v25 }
 0x10f   : > { %v3032_v2 = vpop.eup %3031  ;;  %2895 = vmatpush3.msra.mxu0 %v2386_v25 }
 0x110   : > { %2731 = vmatmul.mubr.f32.gmra.mxu1 %v3020_v59  ;;  %v3034_v3 = vpop.eup %3033  ;;  %2896 = vmatprep.subr.mxu0 %v2385_v27 }
 0x111   : > { %2733 = vmatprep.mubr.f32.mxu1 %v3018_v57  ;;  %v3036_v4 = vpop.eup %3035  ;;  %2897 = vmatpush3.msra.mxu0 %v2385_v27 }
 0x112   : > { %v3038_v5 = vpop.eup %3037  ;;  %2898 = vmatprep.subr.mxu0 %v2384_v29 }
 0x113   : > { %2899 = vmatpush3.msra.mxu0 %v2384_v29 }
 0x114   : > { %2734 = vmatmul.mubr.f32.gmra.mxu1 %v3024_v62  ;;  %2900 = vmatprep.subr.mxu0 %v2383_v30 }
 0x115   : > { %2736 = vmatprep.mubr.f32.mxu1 %v3022_v60  ;;  %2901 = vmatpush3.msra.mxu0 %v2383_v30 }
 0x118   : > { %2737 = vmatmul.mubr.f32.gmra.mxu1 %v3028_v0 }
 0x119   : > { %2739 = vmatprep.mubr.f32.mxu1 %v3026_v63 }
 0x11c   : > { %2740 = vmatmul.mubr.f32.gmra.mxu1 %v3032_v2 }
 0x11d   : > { %2742 = vmatprep.mubr.f32.mxu1 %v3030_v1  ;;  %v3717_v1 = vpop.f32.mrf.mxu0 }
 0x11f   : > { %v3735_v11 = vpop.f32.mrf.mxu0 }
 0x120   : > { %2743 = vmatmul.mubr.f32.gmra.mxu1 %v3036_v4 }
 0x121   : > { %2745 = vmatprep.mubr.f32.mxu1 %v3034_v3  ;;  %v3753_v29 = vpop.f32.mrf.mxu0 }
 0x124   : > { %2746 = vmatmul.mubr.f32.gmra.mxu1 %v3038_v5 }
 0x1a8   : > { %v2702_v39 = vpop.f32.mrf.mxu1 }
 0x1a9   : > { %v3671_v40 = vadd.f32 %v2702_v39, %v3656_v35 }
 0x1aa   : > { %v752_v38 = vpop.f32.mrf.mxu1 }
 0x1ab   : > { %912 = vst [vmem:[%s3668_s13 + $0x8] sm:$0xff] %v3671_v40  ;;  %v982_v41 = vsel %vm3660_vm5, %v3671_v40, 0.0  ;;  %v3679_v42 = vadd.f32 %v3656_v35, %v752_v38 }
 0x1ac   : > { %v1014_v45 = vmul.f32 0.5, %v982_v41  ;;  %v2705_v44 = vpop.f32.mrf.mxu1 }
 0x1ad   : > { %911 = vst [vmem:[%s3668_s13] sm:$0xff] %v3679_v42  ;;  %v981_v46 = vsel %vm3660_vm5, %v3679_v42, 0.0  ;;  %v3689_v47 = vadd.f32 %v2705_v44, %v3656_v35 }
 0x1ae   : > { %v1047_v48 = vmul.f32 1.442695, %v1014_v45  ;;  %v1013_v49 = vmul.f32 0.5, %v981_v46  ;;  %v762_v51 = vpop.f32.mrf.mxu1 }
 0x1af   : > { %914 = vst [vmem:[%s3668_s13 + $0x18] sm:$0xff] %v3689_v47  ;;  %v984_v52 = vsel %vm3660_vm5, %v3689_v47, 0.0  ;;  %v3697_v53 = vadd.f32 %v3656_v35, %v762_v51 }
 0x1b0   : > { %3039 = vpow2.f32 %v1047_v48  ;;  %v1045_v55 = vmul.f32 1.442695, %v1013_v49  ;;  %v1016_v56 = vmul.f32 0.5, %v984_v52  ;;  %v2708_v57 = vpop.f32.mrf.mxu1 }
 0x1b1   : > { %913 = vst [vmem:[%s3668_s13 + $0x10] sm:$0xff] %v3697_v53  ;;  %v983_v58 = vsel %vm3660_vm5, %v3697_v53, 0.0  ;;  %v3707_v59 = vadd.f32 %v2708_v57, %v3656_v35  ;;  %v3773_v57 = vpop.f32.mrf.mxu0 }
 0x1b2   : > { %3041 = vpow2.f32 %v1045_v55  ;;  %v1051_v60 = vmul.f32 1.442695, %v1016_v56  ;;  %v1015_v61 = vmul.f32 0.5, %v983_v58  ;;  %v772_v62 = vpop.f32.mrf.mxu1 }
 0x1b3   : > { %916 = vst [vmem:[%s3668_s13 + $0x28] sm:$0xff] %v3707_v59  ;;  %v986_v63 = vsel %vm3660_vm5, %v3707_v59, 0.0  ;;  %v3715_v0 = vadd.f32 %v3656_v35, %v772_v62 }
 0x1b4   : > { %3043 = vpow2.f32 %v1051_v60  ;;  %v1049_v2 = vmul.f32 1.442695, %v1015_v61  ;;  %v1018_v3 = vmul.f32 0.5, %v986_v63  ;;  %v2711_v4 = vpop.f32.mrf.mxu1 }
 0x1b5   : > { %915 = vst [vmem:[%s3668_s13 + $0x20] sm:$0xff] %v3715_v0  ;;  %v985_v5 = vsel %vm3660_vm5, %v3715_v0, 0.0  ;;  %v3725_v26 = vadd.f32 %v2711_v4, %v3656_v35 }
 0x1b6   : > { %3045 = vpow2.f32 %v1049_v2  ;;  %v1055_v6 = vmul.f32 1.442695, %v1018_v3  ;;  %v1017_v7 = vmul.f32 0.5, %v985_v5  ;;  %v782_v8 = vpop.f32.mrf.mxu1  ;;  %v946_v5 = vsel %vm945_vm6, %v3679_v42, 0.0 }
 0x1b7   : > { %918 = vst [vmem:[%s3668_s13 + $0x38] sm:$0xff] %v3725_v26  ;;  %v988_v9 = vsel %vm3660_vm5, %v3725_v26, 0.0  ;;  %v3733_v10 = vadd.f32 %v3656_v35, %v782_v8 }
 0x1b8   : > { %3047 = vpow2.f32 %v1055_v6  ;;  %v1053_v13 = vmul.f32 1.442695, %v1017_v7  ;;  %v1020_v14 = vmul.f32 0.5, %v988_v9  ;;  %v2714_v16 = vpop.f32.mrf.mxu1 }
 0x1b9   : > { %917 = vst [vmem:[%s3668_s13 + $0x30] sm:$0xff] %v3733_v10  ;;  %v987_v17 = vsel %vm3660_vm5, %v3733_v10, 0.0  ;;  %v3743_v19 = vadd.f32 %v2714_v16, %v3656_v35 }
 0x1ba   : > { %3049 = vpow2.f32 %v1053_v13  ;;  %v1059_v20 = vmul.f32 1.442695, %v1020_v14  ;;  %v1019_v22 = vmul.f32 0.5, %v987_v17  ;;  %v792_v23 = vpop.f32.mrf.mxu1  ;;  %v3798_v14 = vpop.f32.mrf.mxu0 }
 0x1bb   : > { %920 = vst [vmem:[%s3668_s13 + $0x48] sm:$0xff] %v3743_v19  ;;  %v990_v25 = vsel %vm3660_vm5, %v3743_v19, 0.0  ;;  %v3751_v27 = vadd.f32 %v3656_v35, %v792_v23  ;;  %v949_v23 = vsel %vm945_vm6, %v3689_v47, 0.0 }
 0x1bc   : > { %3051 = vpow2.f32 %v1059_v20  ;;  %v1057_v30 = vmul.f32 1.442695, %v1019_v22  ;;  %v1022_v39 = vmul.f32 0.5, %v990_v25  ;;  %v2717_v38 = vpop.f32.mrf.mxu1 }
 0x1bd   : > { %v3040_v41 = vpop.eup %3039  ;;  %919 = vst [vmem:[%s3668_s13 + $0x40] sm:$0xff] %v3751_v27  ;;  %v989_v45 = vsel %vm3660_vm5, %v3751_v27, 0.0  ;;  %v3761_v44 = vadd.f32 %v2717_v38, %v3656_v35  ;;  %v948_v38 = vsel %vm945_vm6, %v3697_v53, 0.0 }
 0x1be   : > { %3053 = vpow2.f32 %v1057_v30  ;;  %v1063_v46 = vmul.f32 1.442695, %v1022_v39  ;;  %v1021_v48 = vmul.f32 0.5, %v989_v45  ;;  %v802_v49 = vpop.f32.mrf.mxu1  ;;  %v1470_v52 = vmul.f32 %v3040_v41, %v3595_v12 }
 0x1bf   : > { %v3042_v51 = vpop.eup %3041  ;;  %922 = vst [vmem:[%s3668_s13 + $0x58] sm:$0xff] %v3761_v44  ;;  %v992_v55 = vsel %vm3660_vm5, %v3761_v44, 0.0  ;;  %v3771_v56 = vadd.f32 %v3656_v35, %v802_v49  ;;  %v947_v12 = vsel %vm945_vm6, %v3671_v40, 0.0 }
 0x1c0   : > { %3055 = vpow2.f32 %v1063_v46  ;;  %v1061_v58 = vmul.f32 1.442695, %v1021_v48  ;;  %v1024_v60 = vmul.f32 0.5, %v992_v55  ;;  %v2720_v61 = vpop.f32.mrf.mxu1  ;;  %v1469_v63 = vmul.f32 %v3042_v51, %v3603_v15  ;;  %v3825_v51 = vpop.f32.mrf.mxu0 }
 0x1c1   : > { %v3044_v62 = vpop.eup %3043  ;;  %921 = vst [vmem:[%s3668_s13 + $0x50] sm:$0xff] %v3771_v56  ;;  %v991_v2 = vsel %vm3660_vm5, %v3771_v56, 0.0  ;;  %v3785_v3 = vadd.f32 %v2720_v61, %v3656_v35  ;;  %v1502_v15 = vadd.f32 %v1470_v52, %v947_v12 }
 0x1c2   : > { %3057 = vpow2.f32 %v1061_v58  ;;  %v1067_v4 = vmul.f32 1.442695, %v1024_v60  ;;  %v1023_v6 = vmul.f32 0.5, %v991_v2  ;;  %v812_v7 = vpop.f32.mrf.mxu1  ;;  %v1501_v8 = vadd.f32 %v1469_v63, %v946_v5 }
 0x1c3   : > { %v3046_v40 = vpop.eup %3045  ;;  %924 = vst [vmem:[%s3668_s13 + $0x68] sm:$0xff] %v3785_v3  ;;  %v994_v9 = vsel %vm3660_vm5, %v3785_v3, 0.0  ;;  %v3796_v13 = vadd.f32 %v3656_v35, %v812_v7  ;;  %v1472_v42 = vmul.f32 %v3044_v62, %v3611_v18  ;;  %v950_v2 = vsel %vm945_vm6, %v3715_v0, 0.0 }
 0x1c4   : > { %3059 = vpow2.f32 %v1067_v4  ;;  %v1065_v16 = vmul.f32 1.442695, %v1023_v6  ;;  %v1026_v17 = vmul.f32 0.5, %v994_v9  ;;  %v2723_v20 = vpop.f32.mrf.mxu1  ;;  %v1471_v25 = vmul.f32 %v3046_v40, %v3619_v21  ;;  %2830 = vmatprep.mubr.f32.mxu1 %v1501_v8 }
 0x1c5   : > { %v3048_v22 = vpop.eup %3047  ;;  %923 = vst [vmem:[%s3668_s13 + $0x60] sm:$0xff] %v3796_v13  ;;  %v993_v30 = vsel %vm3660_vm5, %v3796_v13, 0.0  ;;  %v3811_v39 = vadd.f32 %v2723_v20, %v3656_v35  ;;  %2831 = vmatmul.mubr.f32.vlgmr.msra.gmra.mxu1 %v1502_v15  ;;  %v1504_v53 = vadd.f32 %v1472_v42, %v949_v23  ;;  %v3850_v15 = vpop.f32.mrf.mxu0 }
 0x1c6   : > { %3061 = vpow2.f32 %v1065_v16  ;;  %v1071_v18 = vmul.f32 1.442695, %v1026_v17  ;;  %v1025_v41 = vmul.f32 0.5, %v993_v30  ;;  %v822_v47 = vpop.f32.mrf.mxu1  ;;  %v1503_v45 = vadd.f32 %v1471_v25, %v948_v38 }
 0x1c7   : > { %v3050_v21 = vpop.eup %3049  ;;  %v1474_v46 = vmul.f32 %v3048_v22, %v3627_v24  ;;  %926 = vst [vmem:[%s3668_s13 + $0x78] sm:$0xff] %v3811_v39  ;;  %v996_v48 = vsel %vm3660_vm5, %v3811_v39, 0.0  ;;  %v3823_v49 = vadd.f32 %v3656_v35, %v822_v47  ;;  %v951_v24 = vsel %vm945_vm6, %v3707_v59, 0.0 }
 0x1c8   : > { %3063 = vpow2.f32 %v1071_v18  ;;  %v1069_v52 = vmul.f32 1.442695, %v1025_v41  ;;  %v1028_v55 = vmul.f32 0.5, %v996_v48  ;;  %v2726_v58 = vpop.f32.mrf.mxu1  ;;  %v1473_v61 = vmul.f32 %v3050_v21, %v3635_v28  ;;  %2833 = vmatprep.mubr.f32.mxu1 %v1503_v45  ;;  %v3877_v21 = vpop.f32.mrf.mxu0 }
 0x1c9   : > { %v3052_v60 = vpop.eup %3051  ;;  %925 = vst [vmem:[%s3668_s13 + $0x70] sm:$0xff] %v3823_v49  ;;  %v995_v62 = vsel %vm3660_vm5, %v3823_v49, 0.0  ;;  %v3837_v12 = vadd.f32 %v2726_v58, %v3656_v35  ;;  %2834 = vmatmul.mubr.f32.gmra.mxu1 %v1504_v53  ;;  %v1506_v5 = vadd.f32 %v1474_v46, %v951_v24  ;;  %v953_v17 = vsel %vm945_vm6, %v3725_v26, 0.0 }
 0x1ca   : > { %3065 = vpow2.f32 %v1069_v52  ;;  %v1075_v63 = vmul.f32 1.442695, %v1028_v55  ;;  %v1027_v4 = vmul.f32 0.5, %v995_v62  ;;  %v832_v59 = vpop.f32.mrf.mxu1  ;;  %v1505_v6 = vadd.f32 %v1473_v61, %v950_v2 }
 0x1cb   : > { %v3054_v28 = vpop.eup %3053  ;;  %928 = vst [vmem:[%s3668_s13 + $0x88] sm:$0xff] %v3837_v12  ;;  %v998_v7 = vsel %vm3660_vm5, %v3837_v12, 0.0  ;;  %v3848_v40 = vadd.f32 %v3656_v35, %v832_v59  ;;  %v1476_v8 = vmul.f32 %v3052_v60, %v3643_v31  ;;  %v952_v25 = vsel %vm945_vm6, %v3733_v10, 0.0  ;;  %v3902_v59 = vpop.f32.mrf.mxu0 }
 0x1cc   : > { %3067 = vpow2.f32 %v1075_v63  ;;  %v1073_v0 = vmul.f32 1.442695, %v1027_v4  ;;  %v1030_v9 = vmul.f32 0.5, %v998_v7  ;;  %v2729_v16 = vpop.f32.mrf.mxu1  ;;  %v1475_v20 = vmul.f32 %v3054_v28, %v3645_v33  ;;  %2836 = vmatprep.mubr.f32.mxu1 %v1505_v6 }
 0x1cd   : > { %v3056_v42 = vpop.eup %3055  ;;  %927 = vst [vmem:[%s3668_s13 + $0x80] sm:$0xff] %v3848_v40  ;;  %v997_v22 = vsel %vm3660_vm5, %v3848_v40, 0.0  ;;  %v3863_v23 = vadd.f32 %v2729_v16, %v3656_v35  ;;  %2837 = vmatmul.mubr.f32.gmra.mxu1 %v1506_v5  ;;  %v1508_v10 = vadd.f32 %v1476_v8, %v953_v17  ;;  %v954_v24 = vsel %vm945_vm6, %v3751_v27, 0.0 }
 0x1ce   : > { %3069 = vpow2.f32 %v1073_v0  ;;  %v1079_v31 = vmul.f32 1.442695, %v1030_v9  ;;  %v1029_v30 = vmul.f32 0.5, %v997_v22  ;;  %v842_v26 = vpop.f32.mrf.mxu1  ;;  %v1507_v18 = vadd.f32 %v1475_v20, %v952_v25 }
 0x1cf   : > { %v3058_v33 = vpop.eup %3057  ;;  %v1478_v38 = vmul.f32 %v3056_v42, %v3647_v34  ;;  %930 = vst [vmem:[%s3668_s13 + $0x98] sm:$0xff] %v3863_v23  ;;  %v1000_v41 = vsel %vm3660_vm5, %v3863_v23, 0.0  ;;  %v3875_v47 = vadd.f32 %v3656_v35, %v842_v26  ;;  %v955_v34 = vsel %vm945_vm6, %v3743_v19, 0.0 }
 0x1d0   : > { %3071 = vpow2.f32 %v1079_v31  ;;  %v1077_v45 = vmul.f32 1.442695, %v1029_v30  ;;  %v1032_v46 = vmul.f32 0.5, %v1000_v41  ;;  %v2732_v48 = vpop.f32.mrf.mxu1  ;;  %v1477_v52 = vmul.f32 %v3058_v33, %v3649_v32  ;;  %2839 = vmatprep.mubr.f32.mxu1 %v1507_v18  ;;  %v3929_v30 = vpop.f32.mrf.mxu0 }
 0x1d1   : > { %v3060_v53 = vpop.eup %3059  ;;  %929 = vst [vmem:[%s3668_s13 + $0x90] sm:$0xff] %v3875_v47  ;;  %v999_v55 = vsel %vm3660_vm5, %v3875_v47, 0.0  ;;  %v3889_v58 = vadd.f32 %v2732_v48, %v3656_v35  ;;  %2840 = vmatmul.mubr.f32.gmra.mxu1 %v1508_v10  ;;  %v1510_v62 = vadd.f32 %v1478_v38, %v955_v34  ;;  %v957_v0 = vsel %vm945_vm6, %v3761_v44, 0.0 }
 0x1d2   : > { %3073 = vpow2.f32 %v1077_v45  ;;  %v1083_v60 = vmul.f32 1.442695, %v1032_v46  ;;  %v1031_v61 = vmul.f32 0.5, %v999_v55  ;;  %v852_v19 = vpop.f32.mrf.mxu1  ;;  %v1509_v63 = vadd.f32 %v1477_v52, %v954_v24  ;;  %v3954_v24 = vpop.f32.mrf.mxu0 }
 0x1d3   : > { %v3062_v32 = vpop.eup %3061  ;;  %932 = vst [vmem:[%s3668_s13 + $0xa8] sm:$0xff] %v3889_v58  ;;  %v1002_v2 = vsel %vm3660_vm5, %v3889_v58, 0.0  ;;  %v3900_v4 = vadd.f32 %v3656_v35, %v852_v19  ;;  %v1480_v28 = vmul.f32 %v3060_v53, %v3658_v36  ;;  %v956_v42 = vsel %vm945_vm6, %v3771_v56, 0.0 }
 0x1d4   : > { %3075 = vpow2.f32 %v1083_v60  ;;  %v1081_v27 = vmul.f32 1.442695, %v1031_v61  ;;  %v1034_v5 = vmul.f32 0.5, %v1002_v2  ;;  %v2735_v6 = vpop.f32.mrf.mxu1  ;;  %v1479_v8 = vmul.f32 %v3062_v32, %v3681_v43  ;;  %2842 = vmatprep.mubr.f32.mxu1 %v1509_v63 }
 0x1d5   : > { %v3064_v7 = vpop.eup %3063  ;;  %931 = vst [vmem:[%s3668_s13 + $0xa0] sm:$0xff] %v3900_v4  ;;  %v1001_v9 = vsel %vm3660_vm5, %v3900_v4, 0.0  ;;  %v3915_v16 = vadd.f32 %v2735_v6, %v3656_v35  ;;  %2843 = vmatmul.mubr.f32.gmra.mxu1 %v1510_v62  ;;  %v1512_v56 = vadd.f32 %v1480_v28, %v957_v0  ;;  %v958_v48 = vsel %vm945_vm6, %v3796_v13, 0.0 }
 0x1d6   : > { %3077 = vpow2.f32 %v1081_v27  ;;  %v1087_v36 = vmul.f32 1.442695, %v1034_v5  ;;  %v1033_v17 = vmul.f32 0.5, %v1001_v9  ;;  %v862_v44 = vpop.f32.mrf.mxu1  ;;  %v1511_v20 = vadd.f32 %v1479_v8, %v956_v42 }
 0x1d7   : > { %v3066_v43 = vpop.eup %3065  ;;  %v1482_v22 = vmul.f32 %v3064_v7, %v3699_v54  ;;  %934 = vst [vmem:[%s3668_s13 + $0xb8] sm:$0xff] %v3915_v16  ;;  %v1004_v31 = vsel %vm3660_vm5, %v3915_v16, 0.0  ;;  %v3927_v25 = vadd.f32 %v3656_v35, %v862_v44  ;;  %v959_v54 = vsel %vm945_vm6, %v3785_v3, 0.0 }
 0x1d8   : > { %3079 = vpow2.f32 %v1087_v36  ;;  %v1085_v26 = vmul.f32 1.442695, %v1033_v17  ;;  %v1036_v33 = vmul.f32 0.5, %v1004_v31  ;;  %v2738_v18 = vpop.f32.mrf.mxu1  ;;  %v1481_v41 = vmul.f32 %v3066_v43, %v3717_v1  ;;  %2845 = vmatprep.mubr.f32.mxu1 %v1511_v20  ;;  %v3981_v36 = vpop.f32.mrf.mxu0 }
 0x1d9   : > { %v3068_v38 = vpop.eup %3067  ;;  %933 = vst [vmem:[%s3668_s13 + $0xb0] sm:$0xff] %v3927_v25  ;;  %v1003_v10 = vsel %vm3660_vm5, %v3927_v25, 0.0  ;;  %v3941_v45 = vadd.f32 %v2738_v18, %v3656_v35  ;;  %2846 = vmatmul.mubr.f32.gmra.mxu1 %v1512_v56  ;;  %v1514_v34 = vadd.f32 %v1482_v22, %v959_v54  ;;  %v961_v63 = vsel %vm945_vm6, %v3811_v39, 0.0 }
 0x1da   : > { %3081 = vpow2.f32 %v1085_v26  ;;  %v1091_v46 = vmul.f32 1.442695, %v1036_v33  ;;  %v1035_v53 = vmul.f32 0.5, %v1003_v10  ;;  %v872_v3 = vpop.f32.mrf.mxu1  ;;  %v1513_v52 = vadd.f32 %v1481_v41, %v958_v48  ;;  %v1430_v10 = vpop.f32.mrf.mxu0 }
 0x1db   : > { %v3070_v1 = vpop.eup %3069  ;;  %936 = vst [vmem:[%s3668_s13 + $0xc8] sm:$0xff] %v3941_v45  ;;  %v1006_v55 = vsel %vm3660_vm5, %v3941_v45, 0.0  ;;  %v3952_v60 = vadd.f32 %v3656_v35, %v872_v3  ;;  %v1484_v61 = vmul.f32 %v3068_v38, %v3735_v11  ;;  %v960_v5 = vsel %vm945_vm6, %v3823_v49, 0.0 }
 0x1dc   : > { %3083 = vpow2.f32 %v1091_v46  ;;  %v1089_v13 = vmul.f32 1.442695, %v1035_v53  ;;  %v1038_v19 = vmul.f32 0.5, %v1006_v55  ;;  %v2741_v32 = vpop.f32.mrf.mxu1  ;;  %v1483_v2 = vmul.f32 %v3070_v1, %v3753_v29  ;;  %2848 = vmatprep.mubr.f32.mxu1 %v1513_v52 }
 0x1dd   : > { %v3072_v62 = vpop.eup %3071  ;;  %935 = vst [vmem:[%s3668_s13 + $0xc0] sm:$0xff] %v3952_v60  ;;  %v1005_v27 = vsel %vm3660_vm5, %v3952_v60, 0.0  ;;  %v3967_v28 = vadd.f32 %v2741_v32, %v3656_v35  ;;  %2849 = vmatmul.mubr.f32.gmra.mxu1 %v1514_v34  ;;  %v1516_v49 = vadd.f32 %v1484_v61, %v961_v63  ;;  %v962_v26 = vsel %vm945_vm6, %v3848_v40, 0.0 }
 0x1de   : > { %3085 = vpow2.f32 %v1089_v13  ;;  %v1095_v11 = vmul.f32 1.442695, %v1038_v19  ;;  %v1037_v6 = vmul.f32 0.5, %v1005_v27  ;;  %v882_v39 = vpop.f32.mrf.mxu1  ;;  %v1515_v7 = vadd.f32 %v1483_v2, %v960_v5  ;;  %v2791_v2 = vpop.f32.mrf.mxu0 }
 0x1df   : > { %v3074_v29 = vpop.eup %3073  ;;  %v1486_v0 = vmul.f32 %v3072_v62, %v3773_v57  ;;  %938 = vst [vmem:[%s3668_s13 + $0xd8] sm:$0xff] %v3967_v28  ;;  %v1008_v8 = vsel %vm3660_vm5, %v3967_v28, 0.0  ;;  %v3979_v9 = vadd.f32 %v3656_v35, %v882_v39  ;;  %v963_v57 = vsel %vm945_vm6, %v3837_v12, 0.0 }
 0x1e0   : > { %3087 = vpow2.f32 %v1095_v11  ;;  %v1093_v42 = vmul.f32 1.442695, %v1037_v6  ;;  %v1040_v17 = vmul.f32 0.5, %v1008_v8  ;;  %v2744_v44 = vpop.f32.mrf.mxu1  ;;  %v1485_v20 = vmul.f32 %v3074_v29, %v3798_v14  ;;  %2851 = vmatprep.mubr.f32.mxu1 %v1515_v7 }
 0x1e1   : > { %v3076_v43 = vpop.eup %3075  ;;  %937 = vst [vmem:[%s3668_s13 + $0xd0] sm:$0xff] %v3979_v9  ;;  %v1007_v22 = vsel %vm3660_vm5, %v3979_v9, 0.0  ;;  %v3993_v31 = vadd.f32 %v2744_v44, %v3656_v35  ;;  %2852 = vmatmul.mubr.f32.gmra.mxu1 %v1516_v49  ;;  %v1518_v18 = vadd.f32 %v1486_v0, %v963_v57  ;;  %v965_v1 = vsel %vm945_vm6, %v3863_v23, 0.0  ;;  %v1440_v49 = vpop.f32.mrf.mxu0 }
 0x1e2   : > { %3089 = vpow2.f32 %v1093_v42  ;;  %v1099_v56 = vmul.f32 1.442695, %v1040_v17  ;;  %v1039_v33 = vmul.f32 0.5, %v1007_v22  ;;  %v892_v12 = vpop.f32.mrf.mxu1  ;;  %v1517_v38 = vadd.f32 %v1485_v20, %v962_v26 }
 0x1e3   : > { %v3078_v14 = vpop.eup %3077  ;;  %940 = vst [vmem:[%s3668_s13 + $0xe8] sm:$0xff] %v3993_v31  ;;  %v1010_v54 = vsel %vm3660_vm5, %v3993_v31, 0.0  ;;  %v4004_v41 = vadd.f32 %v3656_v35, %v892_v12  ;;  %v1488_v40 = vmul.f32 %v3076_v43, %v3825_v51  ;;  %v964_v13 = vsel %vm945_vm6, %v3875_v47, 0.0  ;;  %v2794_v20 = vpop.f32.mrf.mxu0 }
 0x1e4   : > { %3091 = vpow2.f32 %v1099_v56  ;;  %v1097_v46 = vmul.f32 1.442695, %v1039_v33  ;;  %v1042_v48 = vmul.f32 0.5, %v1010_v54  ;;  %v2747_v53 = vpop.f32.mrf.mxu1  ;;  %v1487_v34 = vmul.f32 %v3078_v14, %v3850_v15  ;;  %2854 = vmatprep.mubr.f32.mxu1 %v1517_v38 }
 0x1e5   : > { %v3080_v3 = vpop.eup %3079  ;;  %939 = vst [vmem:[%s3668_s13 + $0xe0] sm:$0xff] %v4004_v41  ;;  %v1009_v52 = vsel %vm3660_vm5, %v4004_v41, 0.0  ;;  %v4017_v55 = vadd.f32 %v2747_v53, %v3656_v35  ;;  %2855 = vmatmul.mubr.f32.gmra.mxu1 %v1518_v18  ;;  %v1520_v27 = vadd.f32 %v1488_v40, %v965_v1  ;;  %v967_v6 = vsel %vm945_vm6, %v3889_v58, 0.0  ;;  %v1450_v14 = vpop.f32.mrf.mxu0 }
 0x1e6   : > { %3093 = vpow2.f32 %v1097_v46  ;;  %v1103_v51 = vmul.f32 1.442695, %v1042_v48  ;;  %v1041_v61 = vmul.f32 0.5, %v1009_v52  ;;  %v902_v15 = vpop.f32.mrf.mxu1  ;;  %v1519_v19 = vadd.f32 %v1487_v34, %v964_v13 }
 0x1e7   : > { %v3082_v23 = vpop.eup %3081  ;;  %v1490_v32 = vmul.f32 %v3080_v3, %v3877_v21  ;;  %942 = vst [vmem:[%s3668_s13 + $0xf8] sm:$0xff] %v4017_v55  ;;  %v1012_v62 = vsel %vm3660_vm5, %v4017_v55, 0.0  ;;  %v4029_v63 = vadd.f32 %v3656_v35, %v902_v15  ;;  %v966_v29 = vsel %vm945_vm6, %v3900_v4, 0.0  ;;  %v2797_v40 = vpop.f32.mrf.mxu0 }
 0x1e8   : > { %3095 = vpow2.f32 %v1103_v51  ;;  %v1101_v47 = vmul.f32 1.442695, %v1041_v61  ;;  %v1044_v11 = vmul.f32 0.5, %v1012_v62  ;;  %v1489_v21 = vmul.f32 %v3082_v23, %v3902_v59  ;;  %2857 = vmatprep.mubr.f32.mxu1 %v1519_v19  ;;  %v4091_v62 = vld [vmem:[%s4206_s3 + $0x2] ss:$0 sm:$0xff] }
 0x1e9   : > { %v3084_v5 = vpop.eup %3083  ;;  %941 = vst [vmem:[%s3668_s13 + $0xf0] sm:$0xff] %v4029_v63  ;;  %v1011_v39 = vsel %vm3660_vm5, %v4029_v63, 0.0  ;;  %2858 = vmatmul.mubr.f32.gmra.mxu1 %v1520_v27  ;;  %v1522_v8 = vadd.f32 %v1490_v32, %v967_v6  ;;  %v968_v44 = vsel %vm945_vm6, %v3927_v25, 0.0  ;;  %v969_v57 = vsel %vm945_vm6, %v3915_v16, 0.0  ;;  %v1460_v51 = vpop.f32.mrf.mxu0  ;;  %v2381_v32 = vld [vmem:[%s4205_s2 + $0x190] sm:$0xff] }
 0x1ea   : > { %3097 = vpow2.f32 %v1101_v47  ;;  %v1107_v35 = vmul.f32 1.442695, %v1044_v11  ;;  %v1043_v7 = vmul.f32 0.5, %v1011_v39  ;;  %v1521_v58 = vadd.f32 %v1489_v21, %v966_v29 }
 0x1eb   : > { %v3086_v0 = vpop.eup %3085  ;;  %v1492_v42 = vmul.f32 %v3084_v5, %v3929_v30  ;;  %v970_v25 = vsel %vm945_vm6, %v3952_v60, 0.0  ;;  %v971_v12 = vsel %vm945_vm6, %v3941_v45, 0.0  ;;  %v972_v54 = vsel %vm945_vm6, %v3979_v9, 0.0 }
 0x1ec   : > { %3099 = vpow2.f32 %v1107_v35  ;;  %v1105_v59 = vmul.f32 1.442695, %v1043_v7  ;;  %v1491_v37 = vmul.f32 %v3086_v0, %v3954_v24  ;;  %2860 = vmatprep.mubr.f32.mxu1 %v1521_v58  ;;  %v973_v46 = vsel %vm945_vm6, %v3967_v28, 0.0 }
 0x1ed   : > { %v3088_v17 = vpop.eup %3087  ;;  %2861 = vmatmul.mubr.f32.gmra.mxu1 %v1522_v8  ;;  %v1524_v22 = vadd.f32 %v1492_v42, %v969_v57  ;;  %v974_v1 = vsel %vm945_vm6, %v4004_v41, 0.0  ;;  %v975_v52 = vsel %vm945_vm6, %v3993_v31, 0.0  ;;  %v976_v15 = vsel %vm945_vm6, %v4029_v63, 0.0  ;;  %v2382_v31 = vld [vmem:[%s4205_s2 + $0x198] sm:$0xff] }
 0x1ee   : > { %3101 = vpow2.f32 %v1105_v59  ;;  %v1523_v4 = vadd.f32 %v1491_v37, %v968_v44  ;;  %v1494_v30 = vmul.f32 %v3088_v17, %v3981_v36  ;;  %v977_v41 = vsel %vm945_vm6, %v4017_v55, 0.0  ;;  %2902 = vmatprep.subr.mxu0 %v2382_v31  ;;  %v2379_v55 = vld [vmem:[%s4205_s2 + $0x180] sm:$0xff] }
 0x1ef   : > { %v3090_v43 = vpop.eup %3089  ;;  %2903 = vmatpush3.msra.mxu0 %v2382_v31 }
 0x1f0   : > { %v1493_v56 = vmul.f32 %v3090_v43, %v1430_v10  ;;  %2863 = vmatprep.mubr.f32.mxu1 %v1523_v4  ;;  %v1526_v16 = vadd.f32 %v1494_v30, %v971_v12  ;;  %2904 = vmatprep.subr.mxu0 %v2381_v32 }
 0x1f1   : > { %v3092_v24 = vpop.eup %3091  ;;  %2864 = vmatmul.mubr.f32.gmra.mxu1 %v1524_v22  ;;  %2905 = vmatpush3.msra.mxu0 %v2381_v32 }
 0x1f2   : > { %v1525_v26 = vadd.f32 %v1493_v56, %v970_v25  ;;  %v1496_v18 = vmul.f32 %v3092_v24, %v2791_v2  ;;  %2906 = vmatprep.subr.mxu0 %v2380_v50 }
 0x1f3   : > { %v3094_v33 = vpop.eup %3093  ;;  %2907 = vmatpush3.msra.mxu0 %v2380_v50 }
 0x1f4   : > { %v1495_v38 = vmul.f32 %v3094_v33, %v1440_v49  ;;  %2866 = vmatprep.mubr.f32.mxu1 %v1525_v26  ;;  %v1528_v48 = vadd.f32 %v1496_v18, %v973_v46  ;;  %2908 = vmatprep.subr.mxu0 %v2379_v55 }
 0x1f5   : > { %v3096_v36 = vpop.eup %3095  ;;  %2867 = vmatmul.mubr.f32.gmra.mxu1 %v1526_v16  ;;  %2909 = vmatpush3.msra.mxu0 %v2379_v55 }
 0x1f6   : > { %v1527_v10 = vadd.f32 %v1495_v38, %v972_v54  ;;  %v1498_v45 = vmul.f32 %v3096_v36, %v2794_v20 }
 0x1f7   : > { %v3098_v60 = vpop.eup %3097 }
 0x1f8   : > { %v1497_v53 = vmul.f32 %v3098_v60, %v1450_v14  ;;  %2869 = vmatprep.mubr.f32.mxu1 %v1527_v10  ;;  %v1530_v13 = vadd.f32 %v1498_v45, %v975_v52 }
 0x1f9   : > { %v3100_v3 = vpop.eup %3099  ;;  %2870 = vmatmul.mubr.f32.gmra.mxu1 %v1528_v48 }
 0x1fa   : > { %v1529_v34 = vadd.f32 %v1497_v53, %v974_v1  ;;  %v1500_v28 = vmul.f32 %v3100_v3, %v2797_v40 }
 0x1fb   : > { %v3102_v9 = vpop.eup %3101 }
 0x1fc   : > { %v1499_v61 = vmul.f32 %v3102_v9, %v1460_v51  ;;  %2872 = vmatprep.mubr.f32.mxu1 %v1529_v34  ;;  %v1532_v19 = vadd.f32 %v1500_v28, %v977_v41 }
 0x1fd   : > { %2873 = vmatmul.mubr.f32.gmra.mxu1 %v1530_v13 }
 0x1fe   : > { %v1531_v23 = vadd.f32 %v1499_v61, %v976_v15 }
 0x200   : > { %2875 = vmatprep.mubr.f32.mxu1 %v1531_v23 }
 0x201   : > { %2876 = vmatmul.mubr.f32.gmra.mxu1 %v1532_v19 }
 0x285   : > { %v2832_v63 = vpop.f32.mrf.mxu1 }
 0x286   : > { %v1630_v2 = vadd.f32 %v2832_v63, %v4091_v62 }
 0x287   : > { %v1624_v27 = vpop.f32.mrf.mxu1 }
 0x288   : > { %v1625_v47 = vadd.f32 %v4091_v62, %v1624_v27 }
 0x289   : > { %v2835_v11 = vpop.f32.mrf.mxu1 }
 0x28a   : > { %3103 = vtanh.f32 %v1625_v47  ;;  %v1640_v5 = vadd.f32 %v2835_v11, %v4091_v62 }
 0x28b   : > { %3105 = vtanh.f32 %v1630_v2  ;;  %v1634_v6 = vpop.f32.mrf.mxu1 }
 0x28c   : > { %v1635_v21 = vadd.f32 %v4091_v62, %v1634_v6 }
 0x28d   : > { %v2838_v39 = vpop.f32.mrf.mxu1 }
 0x28e   : > { %3107 = vtanh.f32 %v1635_v21  ;;  %v1650_v35 = vadd.f32 %v2838_v39, %v4091_v62 }
 0x28f   : > { %3109 = vtanh.f32 %v1640_v5  ;;  %v1644_v29 = vpop.f32.mrf.mxu1 }
 0x290   : > { %v1645_v7 = vadd.f32 %v4091_v62, %v1644_v29 }
 0x291   : > { %v2841_v0 = vpop.f32.mrf.mxu1 }
 0x292   : > { %3111 = vtanh.f32 %v1645_v7  ;;  %v1660_v8 = vadd.f32 %v2841_v0, %v4091_v62 }
 0x293   : > { %3113 = vtanh.f32 %v1650_v35  ;;  %v1654_v58 = vpop.f32.mrf.mxu1 }
 0x294   : > { %v1655_v49 = vadd.f32 %v4091_v62, %v1654_v58 }
 0x295   : > { %v2844_v59 = vpop.f32.mrf.mxu1 }
 0x296   : > { %3115 = vtanh.f32 %v1655_v49  ;;  %v1670_v37 = vadd.f32 %v2844_v59, %v4091_v62 }
 0x297   : > { %v3104_v42 = vpop.eup %3103  ;;  %3117 = vtanh.f32 %v1660_v8  ;;  %v1664_v17 = vpop.f32.mrf.mxu1 }
 0x298   : > { %v3106_v44 = vpop.eup %3105  ;;  %v1665_v4 = vadd.f32 %v4091_v62, %v1664_v17  ;;  %2910 = vmatprep.mubr.f32.mxu0 %v3104_v42 }
 0x299   : > { %v2847_v43 = vpop.f32.mrf.mxu1  ;;  %2911 = vmatmul.mubr.f32.vlgmr.msra.gmra.mxu0 %v3106_v44 }
 0x29a   : > { %3119 = vtanh.f32 %v1665_v4  ;;  %v1680_v20 = vadd.f32 %v2847_v43, %v4091_v62 }
 0x29b   : > { %v3108_v57 = vpop.eup %3107  ;;  %3121 = vtanh.f32 %v1670_v37  ;;  %v1674_v22 = vpop.f32.mrf.mxu1 }
 0x29c   : > { %v3110_v30 = vpop.eup %3109  ;;  %v1675_v56 = vadd.f32 %v4091_v62, %v1674_v22  ;;  %2913 = vmatprep.mubr.f32.mxu0 %v3108_v57 }
 0x29d   : > { %v2850_v24 = vpop.f32.mrf.mxu1  ;;  %2914 = vmatmul.mubr.f32.gmra.mxu0 %v3110_v30 }
 0x29e   : > { %3123 = vtanh.f32 %v1675_v56  ;;  %v1690_v26 = vadd.f32 %v2850_v24, %v4091_v62 }
 0x29f   : > { %v3112_v25 = vpop.eup %3111  ;;  %3125 = vtanh.f32 %v1680_v20  ;;  %v1684_v33 = vpop.f32.mrf.mxu1 }
 0x2a0   : > { %v3114_v12 = vpop.eup %3113  ;;  %v1685_v14 = vadd.f32 %v4091_v62, %v1684_v33  ;;  %2916 = vmatprep.mubr.f32.mxu0 %v3112_v25 }
 0x2a1   : > { %v2853_v16 = vpop.f32.mrf.mxu1  ;;  %2917 = vmatmul.mubr.f32.gmra.mxu0 %v3114_v12 }
 0x2a2   : > { %3127 = vtanh.f32 %v1685_v14  ;;  %v1700_v38 = vadd.f32 %v2853_v16, %v4091_v62 }
 0x2a3   : > { %v3116_v18 = vpop.eup %3115  ;;  %3129 = vtanh.f32 %v1690_v26  ;;  %v1694_v36 = vpop.f32.mrf.mxu1 }
 0x2a4   : > { %v3118_v54 = vpop.eup %3117  ;;  %v1695_v10 = vadd.f32 %v4091_v62, %v1694_v36  ;;  %2919 = vmatprep.mubr.f32.mxu0 %v3116_v18 }
 0x2a5   : > { %v2856_v60 = vpop.f32.mrf.mxu1  ;;  %2920 = vmatmul.mubr.f32.gmra.mxu0 %v3118_v54 }
 0x2a6   : > { %3131 = vtanh.f32 %v1695_v10  ;;  %v1710_v40 = vadd.f32 %v2856_v60, %v4091_v62 }
 0x2a7   : > { %v3120_v46 = vpop.eup %3119  ;;  %3133 = vtanh.f32 %v1700_v38  ;;  %v1704_v48 = vpop.f32.mrf.mxu1 }
 0x2a8   : > { %v3122_v45 = vpop.eup %3121  ;;  %v1705_v53 = vadd.f32 %v4091_v62, %v1704_v48  ;;  %2922 = vmatprep.mubr.f32.mxu0 %v3120_v46 }
 0x2a9   : > { %v2859_v3 = vpop.f32.mrf.mxu1  ;;  %2923 = vmatmul.mubr.f32.gmra.mxu0 %v3122_v45 }
 0x2aa   : > { %3135 = vtanh.f32 %v1705_v53  ;;  %v1720_v34 = vadd.f32 %v2859_v3, %v4091_v62 }
 0x2ab   : > { %v3124_v1 = vpop.eup %3123  ;;  %3137 = vtanh.f32 %v1710_v40  ;;  %v1714_v9 = vpop.f32.mrf.mxu1 }
 0x2ac   : > { %v3126_v52 = vpop.eup %3125  ;;  %v1715_v51 = vadd.f32 %v4091_v62, %v1714_v9  ;;  %2925 = vmatprep.mubr.f32.mxu0 %v3124_v1 }
 0x2ad   : > { %v2862_v13 = vpop.f32.mrf.mxu1  ;;  %2926 = vmatmul.mubr.f32.gmra.mxu0 %v3126_v52 }
 0x2ae   : > { %3139 = vtanh.f32 %v1715_v51  ;;  %v1730_v61 = vadd.f32 %v2862_v13, %v4091_v62 }
 0x2af   : > { %v3128_v28 = vpop.eup %3127  ;;  %3141 = vtanh.f32 %v1720_v34  ;;  %v1724_v15 = vpop.f32.mrf.mxu1 }
 0x2b0   : > { %v3130_v23 = vpop.eup %3129  ;;  %v1725_v41 = vadd.f32 %v4091_v62, %v1724_v15  ;;  %2928 = vmatprep.mubr.f32.mxu0 %v3128_v28 }
 0x2b1   : > { %v2865_v19 = vpop.f32.mrf.mxu1  ;;  %2929 = vmatmul.mubr.f32.gmra.mxu0 %v3130_v23 }
 0x2b2   : > { %3143 = vtanh.f32 %v1725_v41  ;;  %v1740_v32 = vadd.f32 %v2865_v19, %v4091_v62 }
 0x2b3   : > { %v3132_v31 = vpop.eup %3131  ;;  %3145 = vtanh.f32 %v1730_v61  ;;  %v1734_v50 = vpop.f32.mrf.mxu1 }
 0x2b4   : > { %v3134_v55 = vpop.eup %3133  ;;  %v1735_v63 = vadd.f32 %v4091_v62, %v1734_v50  ;;  %2931 = vmatprep.mubr.f32.mxu0 %v3132_v31 }
 0x2b5   : > { %v2868_v2 = vpop.f32.mrf.mxu1  ;;  %2932 = vmatmul.mubr.f32.gmra.mxu0 %v3134_v55 }
 0x2b6   : > { %3147 = vtanh.f32 %v1735_v63  ;;  %v1750_v47 = vadd.f32 %v2868_v2, %v4091_v62 }
 0x2b7   : > { %v3136_v27 = vpop.eup %3135  ;;  %3149 = vtanh.f32 %v1740_v32  ;;  %v1744_v11 = vpop.f32.mrf.mxu1 }
 0x2b8   : > { %v3138_v5 = vpop.eup %3137  ;;  %v1745_v6 = vadd.f32 %v4091_v62, %v1744_v11  ;;  %2934 = vmatprep.mubr.f32.mxu0 %v3136_v27 }
 0x2b9   : > { %v2871_v21 = vpop.f32.mrf.mxu1  ;;  %2935 = vmatmul.mubr.f32.gmra.mxu0 %v3138_v5 }
 0x2ba   : > { %3151 = vtanh.f32 %v1745_v6  ;;  %v1760_v35 = vadd.f32 %v2871_v21, %v4091_v62 }
 0x2bb   : > { %v3140_v39 = vpop.eup %3139  ;;  %3153 = vtanh.f32 %v1750_v47  ;;  %v1754_v29 = vpop.f32.mrf.mxu1 }
 0x2bc   : > { %v3142_v7 = vpop.eup %3141  ;;  %v1755_v0 = vadd.f32 %v4091_v62, %v1754_v29  ;;  %2937 = vmatprep.mubr.f32.mxu0 %v3140_v39 }
 0x2bd   : > { %v2874_v8 = vpop.f32.mrf.mxu1  ;;  %2938 = vmatmul.mubr.f32.gmra.mxu0 %v3142_v7 }
 0x2be   : > { %3155 = vtanh.f32 %v1755_v0  ;;  %v1770_v49 = vadd.f32 %v2874_v8, %v4091_v62 }
 0x2bf   : > { %v3144_v58 = vpop.eup %3143  ;;  %3157 = vtanh.f32 %v1760_v35  ;;  %v1764_v59 = vpop.f32.mrf.mxu1 }
 0x2c0   : > { %v3146_v42 = vpop.eup %3145  ;;  %v1765_v37 = vadd.f32 %v4091_v62, %v1764_v59  ;;  %2940 = vmatprep.mubr.f32.mxu0 %v3144_v58 }
 0x2c1   : > { %v2877_v17 = vpop.f32.mrf.mxu1  ;;  %2941 = vmatmul.mubr.f32.gmra.mxu0 %v3146_v42 }
 0x2c2   : > { %3159 = vtanh.f32 %v1765_v37  ;;  %v1780_v4 = vadd.f32 %v2877_v17, %v4091_v62 }
 0x2c3   : > { %v3148_v44 = vpop.eup %3147  ;;  %3161 = vtanh.f32 %v1770_v49  ;;  %v1774_v43 = vpop.f32.mrf.mxu1 }
 0x2c4   : > { %v3150_v57 = vpop.eup %3149  ;;  %v1775_v20 = vadd.f32 %v4091_v62, %v1774_v43  ;;  %2943 = vmatprep.mubr.f32.mxu0 %v3148_v44  ;;  %v4128_v62 = vld [vmem:[%s4206_s3 + $0x3] ss:$0 sm:$0xff] }
 0x2c5   : > { %2944 = vmatmul.mubr.f32.gmra.mxu0 %v3150_v57 }
 0x2c6   : > { %3163 = vtanh.f32 %v1775_v20 }
 0x2c7   : > { %v3152_v22 = vpop.eup %3151  ;;  %3165 = vtanh.f32 %v1780_v4 }
 0x2c8   : > { %v3154_v30 = vpop.eup %3153  ;;  %2946 = vmatprep.mubr.f32.mxu0 %v3152_v22 }
 0x2c9   : > { %2947 = vmatmul.mubr.f32.gmra.mxu0 %v3154_v30 }
 0x2cb   : > { %v3156_v56 = vpop.eup %3155 }
 0x2cc   : > { %v3158_v24 = vpop.eup %3157  ;;  %2949 = vmatprep.mubr.f32.mxu0 %v3156_v56 }
 0x2cd   : > { %2950 = vmatmul.mubr.f32.gmra.mxu0 %v3158_v24 }
 0x2cf   : > { %v3160_v25 = vpop.eup %3159 }
 0x2d0   : > { %v3162_v26 = vpop.eup %3161  ;;  %2952 = vmatprep.mubr.f32.mxu0 %v3160_v25 }
 0x2d1   : > { %2953 = vmatmul.mubr.f32.gmra.mxu0 %v3162_v26 }
 0x2d3   : > { %v3164_v33 = vpop.eup %3163 }
 0x2d4   : > { %v3166_v12 = vpop.eup %3165  ;;  %2955 = vmatprep.mubr.f32.mxu0 %v3164_v33 }
 0x2d5   : > { %2956 = vmatmul.mubr.f32.gmra.mxu0 %v3166_v12 }
 0x359   : > { %v2912_v14 = vpop.f32.mrf.mxu0 }
 0x35a   : > { %v1912_v16 = vadd.f32 %v2912_v14, %v4128_v62 }
 0x35b   : > { %v1906_v18 = vpop.f32.mrf.mxu0 }
 0x35c   : > { %v2067_v38 = vmul.f32 1.442695, %v1912_v16  ;;  %v1907_v36 = vadd.f32 %v4128_v62, %v1906_v18 }
 0x35d   : > { %v2915_v54 = vpop.f32.mrf.mxu0 }
 0x35e   : > { %3167 = vpow2.f32 %v2067_v38  ;;  %v2065_v10 = vmul.f32 1.442695, %v1907_v36  ;;  %v1922_v60 = vadd.f32 %v2915_v54, %v4128_v62 }
 0x35f   : > { %v1916_v46 = vpop.f32.mrf.mxu0 }
 0x360   : > { %3169 = vpow2.f32 %v2065_v10  ;;  %v2071_v40 = vmul.f32 1.442695, %v1922_v60  ;;  %v1917_v48 = vadd.f32 %v4128_v62, %v1916_v46 }
 0x361   : > { %v2918_v45 = vpop.f32.mrf.mxu0 }
 0x362   : > { %3171 = vpow2.f32 %v2071_v40  ;;  %v2069_v53 = vmul.f32 1.442695, %v1917_v48  ;;  %v1932_v3 = vadd.f32 %v2918_v45, %v4128_v62 }
 0x363   : > { %v1926_v1 = vpop.f32.mrf.mxu0 }
 0x364   : > { %3173 = vpow2.f32 %v2069_v53  ;;  %v2075_v34 = vmul.f32 1.442695, %v1932_v3  ;;  %v1927_v9 = vadd.f32 %v4128_v62, %v1926_v1 }
 0x365   : > { %v2921_v52 = vpop.f32.mrf.mxu0 }
 0x366   : > { %3175 = vpow2.f32 %v2075_v34  ;;  %v2073_v51 = vmul.f32 1.442695, %v1927_v9  ;;  %v1942_v13 = vadd.f32 %v2921_v52, %v4128_v62 }
 0x367   : > { %v1936_v28 = vpop.f32.mrf.mxu0 }
 0x368   : > { %3177 = vpow2.f32 %v2073_v51  ;;  %v2079_v61 = vmul.f32 1.442695, %v1942_v13  ;;  %v1937_v15 = vadd.f32 %v4128_v62, %v1936_v28 }
 0x369   : > { %v2924_v23 = vpop.f32.mrf.mxu0 }
 0x36a   : > { %3179 = vpow2.f32 %v2079_v61  ;;  %v2077_v41 = vmul.f32 1.442695, %v1937_v15  ;;  %v1952_v19 = vadd.f32 %v2924_v23, %v4128_v62 }
 0x36b   : > { %v3168_v31 = vpop.eup %3167  ;;  %v1946_v32 = vpop.f32.mrf.mxu0 }
 0x36c   : > { %2130 = vst [vmem:[%s4142_s30 + $0x8] sm:$0xff] %v3168_v31  ;;  %3181 = vpow2.f32 %v2077_v41  ;;  %v2083_v50 = vmul.f32 1.442695, %v1952_v19  ;;  %v1947_v55 = vadd.f32 %v4128_v62, %v1946_v32 }
 0x36d   : > { %v3170_v63 = vpop.eup %3169  ;;  %v2927_v2 = vpop.f32.mrf.mxu0 }
 0x36e   : > { %2129 = vst [vmem:[%s4142_s30] sm:$0xff] %v3170_v63  ;;  %3183 = vpow2.f32 %v2083_v50  ;;  %v2081_v27 = vmul.f32 1.442695, %v1947_v55  ;;  %v1962_v47 = vadd.f32 %v2927_v2, %v4128_v62 }
 0x36f   : > { %v3172_v11 = vpop.eup %3171  ;;  %v1956_v5 = vpop.f32.mrf.mxu0 }
 0x370   : > { %2132 = vst [vmem:[%s4142_s30 + $0x18] sm:$0xff] %v3172_v11  ;;  %3185 = vpow2.f32 %v2081_v27  ;;  %v2087_v6 = vmul.f32 1.442695, %v1962_v47  ;;  %v1957_v21 = vadd.f32 %v4128_v62, %v1956_v5 }
 0x371   : > { %v3174_v39 = vpop.eup %3173  ;;  %v2930_v35 = vpop.f32.mrf.mxu0 }
 0x372   : > { %2131 = vst [vmem:[%s4142_s30 + $0x10] sm:$0xff] %v3174_v39  ;;  %3187 = vpow2.f32 %v2087_v6  ;;  %v2085_v29 = vmul.f32 1.442695, %v1957_v21  ;;  %v1972_v7 = vadd.f32 %v2930_v35, %v4128_v62 }
 0x373   : > { %v3176_v0 = vpop.eup %3175  ;;  %v1966_v8 = vpop.f32.mrf.mxu0 }
 0x374   : > { %2134 = vst [vmem:[%s4142_s30 + $0x28] sm:$0xff] %v3176_v0  ;;  %3189 = vpow2.f32 %v2085_v29  ;;  %v2091_v58 = vmul.f32 1.442695, %v1972_v7  ;;  %v1967_v49 = vadd.f32 %v4128_v62, %v1966_v8 }
 0x375   : > { %v3178_v59 = vpop.eup %3177  ;;  %v2933_v42 = vpop.f32.mrf.mxu0 }
 0x376   : > { %2133 = vst [vmem:[%s4142_s30 + $0x20] sm:$0xff] %v3178_v59  ;;  %3191 = vpow2.f32 %v2091_v58  ;;  %v2089_v37 = vmul.f32 1.442695, %v1967_v49  ;;  %v1982_v17 = vadd.f32 %v2933_v42, %v4128_v62 }
 0x377   : > { %v3180_v44 = vpop.eup %3179  ;;  %v1976_v4 = vpop.f32.mrf.mxu0 }
 0x378   : > { %2136 = vst [vmem:[%s4142_s30 + $0x38] sm:$0xff] %v3180_v44  ;;  %3193 = vpow2.f32 %v2089_v37  ;;  %v2095_v43 = vmul.f32 1.442695, %v1982_v17  ;;  %v1977_v57 = vadd.f32 %v4128_v62, %v1976_v4 }
 0x379   : > { %v3182_v20 = vpop.eup %3181  ;;  %v2936_v22 = vpop.f32.mrf.mxu0 }
 0x37a   : > { %2135 = vst [vmem:[%s4142_s30 + $0x30] sm:$0xff] %v3182_v20  ;;  %3195 = vpow2.f32 %v2095_v43  ;;  %v2093_v30 = vmul.f32 1.442695, %v1977_v57  ;;  %v1992_v56 = vadd.f32 %v2936_v22, %v4128_v62 }
 0x37b   : > { %v3184_v24 = vpop.eup %3183  ;;  %v1986_v25 = vpop.f32.mrf.mxu0 }
 0x37c   : > { %2138 = vst [vmem:[%s4142_s30 + $0x48] sm:$0xff] %v3184_v24  ;;  %3197 = vpow2.f32 %v2093_v30  ;;  %v2099_v26 = vmul.f32 1.442695, %v1992_v56  ;;  %v1987_v33 = vadd.f32 %v4128_v62, %v1986_v25 }
 0x37d   : > { %v3186_v12 = vpop.eup %3185  ;;  %v2939_v14 = vpop.f32.mrf.mxu0 }
 0x37e   : > { %2137 = vst [vmem:[%s4142_s30 + $0x40] sm:$0xff] %v3186_v12  ;;  %3199 = vpow2.f32 %v2099_v26  ;;  %v2097_v16 = vmul.f32 1.442695, %v1987_v33  ;;  %v2002_v18 = vadd.f32 %v2939_v14, %v4128_v62 }
 0x37f   : > { %v3188_v38 = vpop.eup %3187  ;;  %v1996_v36 = vpop.f32.mrf.mxu0 }
 0x380   : > { %2140 = vst [vmem:[%s4142_s30 + $0x58] sm:$0xff] %v3188_v38  ;;  %3201 = vpow2.f32 %v2097_v16  ;;  %v2103_v54 = vmul.f32 1.442695, %v2002_v18  ;;  %v1997_v10 = vadd.f32 %v4128_v62, %v1996_v36 }
 0x381   : > { %v3190_v60 = vpop.eup %3189  ;;  %v2942_v46 = vpop.f32.mrf.mxu0 }
 0x382   : > { %2139 = vst [vmem:[%s4142_s30 + $0x50] sm:$0xff] %v3190_v60  ;;  %3203 = vpow2.f32 %v2103_v54  ;;  %v2101_v40 = vmul.f32 1.442695, %v1997_v10  ;;  %v2012_v48 = vadd.f32 %v2942_v46, %v4128_v62 }
 0x383   : > { %v3192_v45 = vpop.eup %3191  ;;  %v2006_v53 = vpop.f32.mrf.mxu0 }
 0x384   : > { %2142 = vst [vmem:[%s4142_s30 + $0x68] sm:$0xff] %v3192_v45  ;;  %3205 = vpow2.f32 %v2101_v40  ;;  %v2107_v3 = vmul.f32 1.442695, %v2012_v48  ;;  %v2007_v1 = vadd.f32 %v4128_v62, %v2006_v53 }
 0x385   : > { %v3194_v34 = vpop.eup %3193  ;;  %v2945_v9 = vpop.f32.mrf.mxu0 }
 0x386   : > { %2141 = vst [vmem:[%s4142_s30 + $0x60] sm:$0xff] %v3194_v34  ;;  %3207 = vpow2.f32 %v2107_v3  ;;  %v2105_v52 = vmul.f32 1.442695, %v2007_v1  ;;  %v2022_v51 = vadd.f32 %v2945_v9, %v4128_v62 }
 0x387   : > { %v3196_v13 = vpop.eup %3195  ;;  %v2016_v28 = vpop.f32.mrf.mxu0 }
 0x388   : > { %2144 = vst [vmem:[%s4142_s30 + $0x78] sm:$0xff] %v3196_v13  ;;  %3209 = vpow2.f32 %v2105_v52  ;;  %v2111_v61 = vmul.f32 1.442695, %v2022_v51  ;;  %v2017_v15 = vadd.f32 %v4128_v62, %v2016_v28 }
 0x389   : > { %v3198_v23 = vpop.eup %3197  ;;  %v2948_v41 = vpop.f32.mrf.mxu0 }
 0x38a   : > { %2143 = vst [vmem:[%s4142_s30 + $0x70] sm:$0xff] %v3198_v23  ;;  %3211 = vpow2.f32 %v2111_v61  ;;  %v2109_v19 = vmul.f32 1.442695, %v2017_v15  ;;  %v2032_v31 = vadd.f32 %v2948_v41, %v4128_v62 }
 0x38b   : > { %v3200_v32 = vpop.eup %3199  ;;  %v2026_v50 = vpop.f32.mrf.mxu0 }
 0x38c   : > { %2146 = vst [vmem:[%s4142_s30 + $0x88] sm:$0xff] %v3200_v32  ;;  %3213 = vpow2.f32 %v2109_v19  ;;  %v2115_v55 = vmul.f32 1.442695, %v2032_v31  ;;  %v2027_v63 = vadd.f32 %v4128_v62, %v2026_v50 }
 0x38d   : > { %v3202_v2 = vpop.eup %3201  ;;  %v2951_v27 = vpop.f32.mrf.mxu0 }
 0x38e   : > { %2145 = vst [vmem:[%s4142_s30 + $0x80] sm:$0xff] %v3202_v2  ;;  %3215 = vpow2.f32 %v2115_v55  ;;  %v2113_v47 = vmul.f32 1.442695, %v2027_v63  ;;  %v2042_v11 = vadd.f32 %v2951_v27, %v4128_v62 }
 0x38f   : > { %v3204_v5 = vpop.eup %3203  ;;  %v2036_v6 = vpop.f32.mrf.mxu0 }
 0x390   : > { %2148 = vst [vmem:[%s4142_s30 + $0x98] sm:$0xff] %v3204_v5  ;;  %3217 = vpow2.f32 %v2113_v47  ;;  %v2119_v21 = vmul.f32 1.442695, %v2042_v11  ;;  %v2037_v39 = vadd.f32 %v4128_v62, %v2036_v6 }
 0x391   : > { %v3206_v35 = vpop.eup %3205  ;;  %v2954_v29 = vpop.f32.mrf.mxu0 }
 0x392   : > { %2147 = vst [vmem:[%s4142_s30 + $0x90] sm:$0xff] %v3206_v35  ;;  %3219 = vpow2.f32 %v2119_v21  ;;  %v2117_v7 = vmul.f32 1.442695, %v2037_v39  ;;  %v2052_v0 = vadd.f32 %v2954_v29, %v4128_v62 }
 0x393   : > { %v3208_v8 = vpop.eup %3207  ;;  %v2046_v58 = vpop.f32.mrf.mxu0 }
 0x394   : > { %2150 = vst [vmem:[%s4142_s30 + $0xa8] sm:$0xff] %v3208_v8  ;;  %3221 = vpow2.f32 %v2117_v7  ;;  %v2123_v49 = vmul.f32 1.442695, %v2052_v0  ;;  %v2047_v59 = vadd.f32 %v4128_v62, %v2046_v58 }
 0x395   : > { %v3210_v42 = vpop.eup %3209  ;;  %v2957_v37 = vpop.f32.mrf.mxu0 }
 0x396   : > { %2149 = vst [vmem:[%s4142_s30 + $0xa0] sm:$0xff] %v3210_v42  ;;  %3223 = vpow2.f32 %v2123_v49  ;;  %v2121_v17 = vmul.f32 1.442695, %v2047_v59  ;;  %v2062_v44 = vadd.f32 %v2957_v37, %v4128_v62 }
 0x397   : > { %v3212_v4 = vpop.eup %3211  ;;  %v2056_v43 = vpop.f32.mrf.mxu0 }
 0x398   : > { %2152 = vst [vmem:[%s4142_s30 + $0xb8] sm:$0xff] %v3212_v4  ;;  %3225 = vpow2.f32 %v2121_v17  ;;  %v2127_v57 = vmul.f32 1.442695, %v2062_v44  ;;  %v2057_v20 = vadd.f32 %v4128_v62, %v2056_v43 }
 0x399   : > { %v3214_v22 = vpop.eup %3213 }
 0x39a   : > { %2151 = vst [vmem:[%s4142_s30 + $0xb0] sm:$0xff] %v3214_v22  ;;  %3227 = vpow2.f32 %v2127_v57  ;;  %v2125_v30 = vmul.f32 1.442695, %v2057_v20 }
 0x39b   : > { %v3216_v56 = vpop.eup %3215 }
 0x39c   : > { %2154 = vst [vmem:[%s4142_s30 + $0xc8] sm:$0xff] %v3216_v56  ;;  %3229 = vpow2.f32 %v2125_v30 }
 0x39d   : > { %v3218_v24 = vpop.eup %3217 }
 0x39e   : > { %2153 = vst [vmem:[%s4142_s30 + $0xc0] sm:$0xff] %v3218_v24 }
 0x39f   : > { %v3220_v25 = vpop.eup %3219 }
 0x3a0   : > { %2156 = vst [vmem:[%s4142_s30 + $0xd8] sm:$0xff] %v3220_v25 }
 0x3a1   : > { %v3222_v26 = vpop.eup %3221 }
 0x3a2   : > { %2155 = vst [vmem:[%s4142_s30 + $0xd0] sm:$0xff] %v3222_v26 }
 0x3a3   : > { %v3224_v33 = vpop.eup %3223 }
 0x3a4   : > { %2158 = vst [vmem:[%s4142_s30 + $0xe8] sm:$0xff] %v3224_v33 }
 0x3a5   : > { %v3226_v12 = vpop.eup %3225 }
 0x3a6   : > { %2157 = vst [vmem:[%s4142_s30 + $0xe0] sm:$0xff] %v3226_v12 }
 0x3a7   : > { %v3228_v62 = vpop.eup %3227 }
 0x3a8   : > { %2160 = vst [vmem:[%s4142_s30 + $0xf8] sm:$0xff] %v3228_v62 }
 0x3a9   : > { %v3230_v14 = vpop.eup %3229 }
 0x3aa   : > { %2159 = vst [vmem:[%s4142_s30 + $0xf0] sm:$0xff] %v3230_v14 }
 0x3ab PF: > { %s16_s18 = sadd.s32 1, %s3237_s18  }
 0x3ac   : > { %p13_p4 = scmp.ge.s32.totalorder %s16_s18, 4  }
 0x3ae   :  { %15 = sbr.rel (!%p13_p4) target bundleno = 1 (0x1), region = 87 }

</bundles_post_ra>
